<compile_context>
chip_gen: v5e
topology: v5e:2x2
jax: 0.10.0
libtpu: 0.0.40
codegen_flags: <defaults>
</compile_context>

<pallas_src>
import functools

import jax
import jax.numpy as jnp
from jax.experimental import pallas as pl
from jax.experimental.pallas import tpu as pltpu

EPS = 1e-5
_VMEM_LIMIT = 32 * 1024 * 1024  # fits the scoped-VMEM default on v5e/v6e/v7x


def _round_up(x, m):
    return (x + m - 1) // m * m


# ---------------------------------------------------------------------------
# Pallas kernels
# ---------------------------------------------------------------------------
def _deconv_block_kernel(a_ref, w_ref, shift_ref, o_ref, *, relu):
    # (tm, 4Cin)bf16 @ (4Cin, 4Cout)bf16 on the MXU, f32 accumulate, fused
    # folded-BN shift (+ optional ReLU) epilogue in f32, bf16 store.
    y = jnp.dot(a_ref[...], w_ref[...], preferred_element_type=jnp.float32)
    y = y + shift_ref[...]
    if relu:
        y = jnp.maximum(y, 0.0)
    o_ref[...] = y.astype(o_ref.dtype)


def _concat_conv_kernel(wt_ref, xt_ref, shift_ref, o_ref):
    # Lane-dense 1x1 conv: (2, Csum) @ (Csum, tm) so the big M dim is on lanes.
    y = jnp.dot(wt_ref[...], xt_ref[...], preferred_element_type=jnp.float32)
    o_ref[...] = y + shift_ref[...]


def _softmax_rows_kernel(x_ref, o_ref):
    x = x_ref[...]
    m = jnp.max(x, axis=-1, keepdims=True)
    e = jnp.exp(x - m)
    s = jnp.sum(e, axis=-1, keepdims=True)
    o_ref[...] = e * pl.reciprocal(s, approx=True)  # EUP reciprocal, off the VALU


# ---------------------------------------------------------------------------
# ConvTranspose2d(k=3, s=2, p=4) + BatchNorm (+ReLU) as a phase-block matmul
# ---------------------------------------------------------------------------
def _fold_deconv_layer(p):
    """Torch deconv weight (Cin,Cout,3,3) + bias + eval-mode BN ->
    phase-block weight (4Cin, 4Cout) with BN scale folded in, plus per-column
    shift.  Row order: (patch dy, patch dx, cin); column order: (rh, rw, cout).

    Output pixel (2q+rh, 2s+rw) = sum over valid (pa, pb) of
        x[q+1+pa, s+1+pb] . w[:, :, 2-2*pa+rh, 2-2*pb+rw]
    which is exactly the stride-2 deconv with padding=4 (no dilated zeros)."""
    w = p["w"]
    Cin, Cout = w.shape[0], w.shape[1]
    scale = p["gamma"] / jnp.sqrt(p["var"] + EPS)
    shift = (p["b"] - p["mean"]) * scale + p["beta"]

    wb = jnp.zeros((2, 2, Cin, 2, 2, Cout), jnp.float32)
    for pa in range(2):          # patch offset: input pixel x[q+1+pa, s+1+pb]
        for pb in range(2):
            for rh in range(2):  # output sub-pixel phase
                for rw in range(2):
                    kh = 2 - 2 * pa + rh
                    kw = 2 - 2 * pb + rw
                    if 0 <= kh <= 2 and 0 <= kw <= 2:
                        wb = wb.at[pa, pb, :, rh, rw, :].set(w[:, :, kh, kw])
    w_eff = (wb * scale).reshape(4 * Cin, 4 * Cout).astype(jnp.bfloat16)
    shift4 = jnp.tile(shift, 4).reshape(1, 4 * Cout).astype(jnp.float32)
    return w_eff, shift4


def _prepare_branch_group(branch_param_lists):
    """Stack per-layer folded weights over identically-shaped branches so each
    layer runs as a single pallas_call with a branch grid axis."""
    n_layers = len(branch_param_lists[0])
    out = []
    for l in range(n_layers):
        folded = [_fold_deconv_layer(br[l]) for br in branch_param_lists]
        w_eff = jnp.stack([f[0] for f in folded])   # (B, 4Cin, 4Cout) bf16
        shift = jnp.stack([f[1] for f in folded])   # (B, 1, 4Cout)   f32
        out.append((w_eff, shift))
    return out


def deconv_bn_layer(x, w_eff, shift, relu):
    """One deconv+BN(+ReLU) layer for a stack of B branches.

    x:      (B, N, H, W, Cin)  bf16 NHWC activations
    w_eff:  (B, 4*Cin, 4*Cout) bf16 phase-block weights (BN scale folded in)
    shift:  (B, 1, 4*Cout)     f32  folded BN shift (conv bias included)
    returns (B, N, 2H-7, 2W-7, Cout) bf16
    """
    B, N, H, W, Cin = x.shape
    K = 4 * Cin
    C4 = w_eff.shape[-1]
    Cout = C4 // 4
    Hq, Wq = H - 3, W - 3

    # 2x2 patch extraction (no zero-dilated rows); row order (pa, pb, cin)
    # matches the folded weight rows.
    p00 = x[:, :, 1:H - 2, 1:W - 2, :]
    p01 = x[:, :, 1:H - 2, 2:W - 1, :]
    p10 = x[:, :, 2:H - 1, 1:W - 2, :]
    p11 = x[:, :, 2:H - 1, 2:W - 1, :]
    a = jnp.concatenate([p00, p01, p10, p11], axis=-1)       # (B,N,Hq,Wq,4Cin)
    M = N * Hq * Wq
    a = a.reshape(B, M, K)

    tm = min(512, _round_up(M, 16))     # M tile (multiple of 16 for bf16 packing)
    Mp = _round_up(M, tm)
    a = jnp.pad(a, ((0, 0), (0, Mp - M), (0, 0)))

    y = pl.pallas_call(
        functools.partial(_deconv_block_kernel, relu=relu),
        out_shape=jax.ShapeDtypeStruct((B, Mp, C4), jnp.bfloat16),
        grid=(B, Mp // tm),
        in_specs=[
            pl.BlockSpec((None, tm, K), lambda b, i: (b, i, 0)),
            pl.BlockSpec((None, K, C4), lambda b, i: (b, 0, 0)),
            pl.BlockSpec((None, 1, C4), lambda b, i: (b, 0, 0)),
        ],
        out_specs=pl.BlockSpec((None, tm, C4), lambda b, i: (b, i, 0)),
        compiler_params=pltpu.CompilerParams(
            dimension_semantics=("parallel", "parallel"),
            vmem_limit_bytes=_VMEM_LIMIT,
        ),
    )(a, w_eff, shift)
    # NOTE: K = 4*Cin <= 1024 even at production channel counts, so no K tiling
    #       / accumulator scratch is needed; the reduction stays in one dot.

    # depth-to-space: columns are (rh, rw, cout) phase blocks -> interleave into
    # the output grid, then crop the extra odd row/col down to (2H-7, 2W-7).
    y = y[:, :M, :].reshape(B, N, Hq, Wq, 2, 2, Cout)
    y = jnp.transpose(y, (0, 1, 2, 4, 3, 5, 6)).reshape(B, N, 2 * Hq, 2 * Wq, Cout)
    return y[:, :, :2 * H - 7, :2 * W - 7, :]


# ---------------------------------------------------------------------------
# concat_conv (1x1, padding=2) + concat_bn, lane-dense transposed matmul
# ---------------------------------------------------------------------------
def concat_conv_bn(xcat, wc, bias, gamma, beta, mean, var):
    """Returns (logits NCHW (N,2,H,W) f32, folded shift (2,) f32)."""
    N, H, W, Csum = xcat.shape
    scale = gamma / jnp.sqrt(var + EPS)
    shift = ((bias - mean) * scale + beta).astype(jnp.float32)      # (2,)
    wt = (wc[:, :, 0, 0] * scale[:, None]).astype(jnp.bfloat16)     # (2, Csum)

    M = N * H * W
    xt = jnp.transpose(xcat.reshape(M, Csum)).astype(jnp.bfloat16)  # (Csum, M)
    tm = min(1024, _round_up(M, 128))
    Mp = _round_up(M, tm)
    xt = jnp.pad(xt, ((0, 0), (0, Mp - M)))

    logits_t = pl.pallas_call(
        _concat_conv_kernel,
        out_shape=jax.ShapeDtypeStruct((2, Mp), jnp.float32),
        grid=(Mp // tm,),
        in_specs=[
            pl.BlockSpec((2, Csum), lambda i: (0, 0)),
            pl.BlockSpec((Csum, tm), lambda i: (0, i)),
            pl.BlockSpec((2, 1), lambda i: (0, 0)),
        ],
        out_specs=pl.BlockSpec((2, tm), lambda i: (0, i)),
        compiler_params=pltpu.CompilerParams(
            dimension_semantics=("parallel",),
            vmem_limit_bytes=_VMEM_LIMIT,
        ),
    )(wt, xt, shift.reshape(2, 1))
    logits = jnp.transpose(logits_t[:, :M].reshape(2, N, H, W), (1, 0, 2, 3))
    return logits, shift


def softmax_rows(x):
    """x: (R, H) f32; softmax over the last axis, rows tiled over the grid."""
    R, H = x.shape
    tr = min(1024, _round_up(R, 8))
    Rp = _round_up(R, tr)
    xp = jnp.pad(x, ((0, Rp - R), (0, 0)))
    y = pl.pallas_call(
        _softmax_rows_kernel,
        out_shape=jax.ShapeDtypeStruct((Rp, H), jnp.float32),
        grid=(Rp // tr,),
        in_specs=[pl.BlockSpec((tr, H), lambda i: (i, 0))],
        out_specs=pl.BlockSpec((tr, H), lambda i: (i, 0)),
        compiler_params=pltpu.CompilerParams(
            dimension_semantics=("parallel",),
        ),
    )(xp)
    return y[:R]


# ---------------------------------------------------------------------------
# Forward pass (mirrors DecoderRecovery.forward)
# ---------------------------------------------------------------------------
def decoder_recovery_forward(params, m6_decoder, stage_56, stage_456,
                             stage_3456, stage_23456):
    # Inputs are NCHW (PyTorch convention); internal layout is NHWC with bf16
    # MXU operands and f32 accumulation/epilogues.
    def to_nhwc(x):
        return jnp.transpose(x, (0, 2, 3, 1)).astype(jnp.bfloat16)

    def run_group(x_stack, branch_param_lists):
        layers = _prepare_branch_group(branch_param_lists)
        n = len(layers)
        for l, (w_eff, shift) in enumerate(layers):
            x_stack = deconv_bn_layer(x_stack, w_eff, shift, relu=(l < n - 1))
        return x_stack

    # m6/m5/m4 share shapes and depth -> batch them as one 3-wide branch axis so
    # each of their three layers is a single pallas_call.
    x456 = run_group(
        jnp.stack([to_nhwc(m6_decoder), to_nhwc(stage_56), to_nhwc(stage_456)]),
        [params["m6"], params["m5"], params["m4"]])
    x3 = run_group(to_nhwc(stage_3456)[None], [params["m3"]])
    x2 = run_group(to_nhwc(stage_23456)[None], [params["m2"]])

    # torch.cat(dim=1) in NCHW == channel concat in NHWC
    xcat = jnp.concatenate([x456[0], x456[1], x456[2], x3[0], x2[0]], axis=-1)

    # concat_conv + concat_bn as a lane-dense (2, M) matmul.
    pc = params["concat"]
    logits, shift = concat_conv_bn(xcat, pc["w"], pc["b"], pc["gamma"],
                                   pc["beta"], pc["mean"], pc["var"])

    # Conv padding=2: border pixels only see the (BN-folded) bias == shift.
    pad_val = shift.reshape(1, 2, 1, 1)
    padded = jnp.pad(logits - pad_val, ((0, 0), (0, 0), (2, 2), (2, 2))) + pad_val
    Nb, Cb, Hp, Wp = padded.shape

    # nn.Softmax(2) over H: flatten to (N*C*W, H) with H on the lane axis.
    rows = jnp.transpose(padded, (0, 1, 3, 2)).reshape(Nb * Cb * Wp, Hp)
    sm = softmax_rows(rows)
    return jnp.transpose(sm.reshape(Nb, Cb, Wp, Hp), (0, 1, 3, 2))  # NCHW


# ---------------------------------------------------------------------------
# Pure-JAX f32 reference (dilate+crop+flipped VALID conv) for validation
# ---------------------------------------------------------------------------
def _reference_forward(params, m6_decoder, stage_56, stage_456,
                       stage_3456, stage_23456):
    def to_nhwc(x):
        return jnp.transpose(x, (0, 2, 3, 1)).astype(jnp.float32)

    def deconv_bn_ref(x, p, relu):
        N, H, W, C = x.shape
        xd = jnp.zeros((N, 2 * H - 1, 2 * W - 1, C), jnp.float32)
        xd = xd.at[:, ::2, ::2, :].set(x)[:, 2:-2, 2:-2, :]
        w = jnp.transpose(p["w"][:, :, ::-1, ::-1], (2, 3, 0, 1))  # HWIO, flipped
        y = jax.lax.conv_general_dilated(
            xd, w, (1, 1), "VALID",
            dimension_numbers=("NHWC", "HWIO", "NHWC")) + p["b"]
        scale = p["gamma"] / jnp.sqrt(p["var"] + EPS)
        y = (y - p["mean"]) * scale + p["beta"]
        return jnp.maximum(y, 0.0) if relu else y

    def run(x, layers):
        for i, p in enumerate(layers):
            x = deconv_bn_ref(x, p, relu=(i < len(layers) - 1))
        return x

    s6 = run(to_nhwc(m6_decoder), params["m6"])
    s56 = run(to_nhwc(stage_56), params["m5"])
    s456 = run(to_nhwc(stage_456), params["m4"])
    s3 = run(to_nhwc(stage_3456), params["m3"])
    s2 = run(to_nhwc(stage_23456), params["m2"])
    xcat = jnp.concatenate([s6, s56, s456, s3, s2], axis=-1)
    xp = jnp.pad(xcat, ((0, 0), (2, 2), (2, 2), (0, 0)))
    pc = params["concat"]
    y = jnp.einsum("nhwc,oc->nhwo", xp, pc["w"][:, :, 0, 0]) + pc["b"]
    scale = pc["gamma"] / jnp.sqrt(pc["var"] + EPS)
    y = (y - pc["mean"]) * scale + pc["beta"]
    y = jnp.transpose(y, (0, 3, 1, 2))
    return jax.nn.softmax(y, axis=2)


# ---------------------------------------------------------------------------
# Deterministic parameter construction (shapes follow the nn.Module __init__)
# ---------------------------------------------------------------------------
def _bn_params(key, c):
    k1, k2, k3, k4 = jax.random.split(key, 4)
    return dict(
        gamma=1.0 + 0.1 * jax.random.normal(k1, (c,), jnp.float32),
        beta=0.1 * jax.random.normal(k2, (c,), jnp.float32),
        mean=0.1 * jax.random.normal(k3, (c,), jnp.float32),
        var=0.5 + jax.random.uniform(k4, (c,), jnp.float32),
    )


def _deconv_params(key, c):
    kw, kb, kbn = jax.random.split(key, 3)
    p = dict(
        w=0.1 * jax.random.normal(kw, (c, c, 3, 3), jnp.float32),
        b=0.1 * jax.random.normal(kb, (c,), jnp.float32),
    )
    p.update(_bn_params(kbn, c))
    return p


def init_params(key, channels=(8, 16, 32)):
    m2c, m3c, m456c = channels
    keys = iter(jax.random.split(key, 16))
    params = dict(
        m6=[_deconv_params(next(keys), m456c) for _ in range(3)],
        m5=[_deconv_params(next(keys), m456c) for _ in range(3)],
        m4=[_deconv_params(next(keys), m456c) for _ in range(3)],
        m3=[_deconv_params(next(keys), m3c) for _ in range(2)],
        m2=[_deconv_params(next(keys), m2c) for _ in range(1)],
    )
    csum = m2c + m3c + 3 * m456c
    kw, kb, kbn = jax.random.split(next(keys), 3)
    params["concat"] = dict(
        w=0.1 * jax.random.normal(kw, (2, csum, 1, 1), jnp.float32),
        b=0.1 * jax.random.normal(kb, (2,), jnp.float32),
    )
    params["concat"].update(_bn_params(kbn, 2))
    return params


# ---------------------------------------------------------------------------
if __name__ == "__main__":
    key = jax.random.PRNGKey(0)
    channels = (8, 16, 32)          # small stand-in for [64, 128, 256]
    pkey, dkey = jax.random.split(key)
    params = init_params(pkey, channels)

    # spatial sizes so all five branches land on the same 15x15 map:
    #   3 deconvs: 8 -> 9 -> 11 -> 15 ; 2 deconvs: 9 -> 11 -> 15 ; 1: 11 -> 15
    N = 2
    ks = jax.random.split(dkey, 5)
    m6_decoder = jax.random.normal(ks[0], (N, channels[2], 8, 8), jnp.float32)
    stage_56 = jax.random.normal(ks[1], (N, channels[2], 8, 8), jnp.float32)
    stage_456 = jax.random.normal(ks[2], (N, channels[2], 8, 8), jnp.float32)
    stage_3456 = jax.random.normal(ks[3], (N, channels[1], 9, 9), jnp.float32)
    stage_23456 = jax.random.normal(ks[4], (N, channels[0], 11, 11), jnp.float32)

    fwd = jax.jit(decoder_recovery_forward)
    out = jax.block_until_ready(fwd(params, m6_decoder, stage_56, stage_456,
                                    stage_3456, stage_23456))

    # output: concat map 15x15, padded by 2 -> 19x19, 2 channels, NCHW
    assert out.shape == (N, 2, 19, 19), out.shape
    # Softmax(dim=2) must sum to ~1 along H (approx reciprocal -> loose atol)
    sums = jnp.sum(out, axis=2)
    assert jnp.allclose(sums, 1.0, atol=1e-2), float(jnp.max(jnp.abs(sums - 1.0)))

    # Validate against a pure-JAX f32 reference (bf16 MXU ops -> loose tolerance)
    ref = _reference_forward(params, m6_decoder, stage_56, stage_456,
                             stage_3456, stage_23456)
    diff = jnp.abs(out.astype(jnp.float32) - ref)
    assert float(jnp.max(diff)) < 1e-1, float(jnp.max(diff))
    assert float(jnp.mean(diff)) < 1e-2, float(jnp.mean(diff))

    print("KERNEL_OK")
</pallas_src>

<mosaic_0001>
module attributes {stable_mosaic.version = 11 : i64} {
  func.func @_deconv_block_kernel(%arg0: i32, %arg1: i32, %arg2: memref<1x64x128xbf16, #tpu.memory_space<vmem>>, %arg3: memref<1x128x128xbf16, #tpu.memory_space<vmem>>, %arg4: memref<1x1x128xf32, #tpu.memory_space<vmem>>, %arg5: memref<1x64x128xbf16, #tpu.memory_space<vmem>>) attributes {dimension_semantics = [#tpu.dimension_semantics<parallel>, #tpu.dimension_semantics<parallel>], iteration_bounds = array<i64: 3, 1>, scalar_prefetch = 0 : i64, scratch_operands = 0 : i64, tpu.core_type = #tpu.core_type<tc>, window_params = [{transform_indices = @transform_0, window_bounds = array<i64: 1, 64, 128>}, {transform_indices = @transform_1, window_bounds = array<i64: 1, 128, 128>}, {transform_indices = @transform_2, window_bounds = array<i64: 1, 1, 128>}, {transform_indices = @transform_3, window_bounds = array<i64: 1, 64, 128>}]} {
    %c0 = arith.constant 0 : index
    %c0_0 = arith.constant 0 : index
    %c0_1 = arith.constant 0 : index
    %0 = vector.load %arg2[%c0, %c0_0, %c0_1] : memref<1x64x128xbf16, #tpu.memory_space<vmem>>, vector<1x64x128xbf16>
    %1 = vector.shape_cast %0 : vector<1x64x128xbf16> to vector<64x128xbf16>
    %c0_2 = arith.constant 0 : index
    %c0_3 = arith.constant 0 : index
    %c0_4 = arith.constant 0 : index
    %2 = vector.load %arg3[%c0_2, %c0_3, %c0_4] : memref<1x128x128xbf16, #tpu.memory_space<vmem>>, vector<1x128x128xbf16>
    %3 = vector.shape_cast %2 : vector<1x128x128xbf16> to vector<128x128xbf16>
    %cst = arith.constant dense<0.000000e+00> : vector<64x128xf32>
    %4 = tpu.matmul %1, %3, %cst {dimension_numbers = #tpu.dot_dimension_numbers<[1], [0], [0], [1], [0, 0, 1, 1], [], []>} : vector<64x128xbf16>, vector<128x128xbf16>, vector<64x128xf32> -> vector<64x128xf32>
    %c0_5 = arith.constant 0 : index
    %c0_6 = arith.constant 0 : index
    %c0_7 = arith.constant 0 : index
    %5 = vector.load %arg4[%c0_5, %c0_6, %c0_7] : memref<1x1x128xf32, #tpu.memory_space<vmem>>, vector<1x1x128xf32>
    %6 = vector.shape_cast %5 : vector<1x1x128xf32> to vector<1x128xf32>
    %7 = vector.broadcast %6 : vector<1x128xf32> to vector<64x128xf32>
    %8 = arith.addf %4, %7 : vector<64x128xf32>
    %cst_8 = arith.constant 0.000000e+00 : f32
    %9 = vector.broadcast %cst_8 : f32 to vector<64x128xf32>
    %10 = arith.maximumf %8, %9 : vector<64x128xf32>
    %11 = arith.truncf %10 : vector<64x128xf32> to vector<64x128xbf16>
    %c0_9 = arith.constant 0 : index
    %c0_10 = arith.constant 0 : index
    %c0_11 = arith.constant 0 : index
    %12 = vector.load %arg5[%c0_9, %c0_10, %c0_11] : memref<1x64x128xbf16, #tpu.memory_space<vmem>>, vector<1x64x128xbf16>
    %13 = vector.shape_cast %12 : vector<1x64x128xbf16> to vector<64x128xbf16>
    %14 = vector.shape_cast %11 : vector<64x128xbf16> to vector<1x64x128xbf16>
    tpu.vector_store %arg5[%c0_9, %c0_10, %c0_11], %14 {strides = array<i32>} : memref<1x64x128xbf16, #tpu.memory_space<vmem>>, vector<1x64x128xbf16>,
    return
  }
  func.func @transform_0(%arg0: i32, %arg1: i32) -> (i32, i32, i32) {
    %c0_i32 = arith.constant 0 : i32
    %c0_i32_0 = arith.constant 0 : i32
    return %arg0, %arg1, %c0_i32 : i32, i32, i32
  }
  func.func @transform_1(%arg0: i32, %arg1: i32) -> (i32, i32, i32) {
    %c0_i32 = arith.constant 0 : i32
    %c0_i32_0 = arith.constant 0 : i32
    %c0_i32_1 = arith.constant 0 : i32
    return %arg0, %c0_i32, %c0_i32_0 : i32, i32, i32
  }
  func.func @transform_2(%arg0: i32, %arg1: i32) -> (i32, i32, i32) {
    %c0_i32 = arith.constant 0 : i32
    %c0_i32_0 = arith.constant 0 : i32
    %c0_i32_1 = arith.constant 0 : i32
    return %arg0, %c0_i32, %c0_i32_0 : i32, i32, i32
  }
  func.func @transform_3(%arg0: i32, %arg1: i32) -> (i32, i32, i32) {
    %c0_i32 = arith.constant 0 : i32
    %c0_i32_0 = arith.constant 0 : i32
    return %arg0, %arg1, %c0_i32 : i32, i32, i32
  }
}

module attributes {stable_mosaic.version = 11 : i64} {
  func.func @_deconv_block_kernel(%arg0: i32, %arg1: i32, %arg2: memref<1x80x128xbf16, #tpu.memory_space<vmem>>, %arg3: memref<1x128x128xbf16, #tpu.memory_space<vmem>>, %arg4: memref<1x1x128xf32, #tpu.memory_space<vmem>>, %arg5: memref<1x80x128xbf16, #tpu.memory_space<vmem>>) attributes {dimension_semantics = [#tpu.dimension_semantics<parallel>, #tpu.dimension_semantics<parallel>], iteration_bounds = array<i64: 3, 1>, scalar_prefetch = 0 : i64, scratch_operands = 0 : i64, tpu.core_type = #tpu.core_type<tc>, window_params = [{transform_indices = @transform_0, window_bounds = array<i64: 1, 80, 128>}, {transform_indices = @transform_1, window_bounds = array<i64: 1, 128, 128>}, {transform_indices = @transform_2, window_bounds = array<i64: 1, 1, 128>}, {transform_indices = @transform_3, window_bounds = array<i64: 1, 80, 128>}]} {
    %c0 = arith.constant 0 : index
    %c0_0 = arith.constant 0 : index
    %c0_1 = arith.constant 0 : index
    %0 = vector.load %arg2[%c0, %c0_0, %c0_1] : memref<1x80x128xbf16, #tpu.memory_space<vmem>>, vector<1x80x128xbf16>
    %1 = vector.shape_cast %0 : vector<1x80x128xbf16> to vector<80x128xbf16>
    %c0_2 = arith.constant 0 : index
    %c0_3 = arith.constant 0 : index
    %c0_4 = arith.constant 0 : index
    %2 = vector.load %arg3[%c0_2, %c0_3, %c0_4] : memref<1x128x128xbf16, #tpu.memory_space<vmem>>, vector<1x128x128xbf16>
    %3 = vector.shape_cast %2 : vector<1x128x128xbf16> to vector<128x128xbf16>
    %cst = arith.constant dense<0.000000e+00> : vector<80x128xf32>
    %4 = tpu.matmul %1, %3, %cst {dimension_numbers = #tpu.dot_dimension_numbers<[1], [0], [0], [1], [0, 0, 1, 1], [], []>} : vector<80x128xbf16>, vector<128x128xbf16>, vector<80x128xf32> -> vector<80x128xf32>
    %c0_5 = arith.constant 0 : index
    %c0_6 = arith.constant 0 : index
    %c0_7 = arith.constant 0 : index
    %5 = vector.load %arg4[%c0_5, %c0_6, %c0_7] : memref<1x1x128xf32, #tpu.memory_space<vmem>>, vector<1x1x128xf32>
    %6 = vector.shape_cast %5 : vector<1x1x128xf32> to vector<1x128xf32>
    %7 = vector.broadcast %6 : vector<1x128xf32> to vector<80x128xf32>
    %8 = arith.addf %4, %7 : vector<80x128xf32>
    %cst_8 = arith.constant 0.000000e+00 : f32
    %9 = vector.broadcast %cst_8 : f32 to vector<80x128xf32>
    %10 = arith.maximumf %8, %9 : vector<80x128xf32>
    %11 = arith.truncf %10 : vector<80x128xf32> to vector<80x128xbf16>
    %c0_9 = arith.constant 0 : index
    %c0_10 = arith.constant 0 : index
    %c0_11 = arith.constant 0 : index
    %12 = vector.load %arg5[%c0_9, %c0_10, %c0_11] : memref<1x80x128xbf16, #tpu.memory_space<vmem>>, vector<1x80x128xbf16>
    %13 = vector.shape_cast %12 : vector<1x80x128xbf16> to vector<80x128xbf16>
    %14 = vector.shape_cast %11 : vector<80x128xbf16> to vector<1x80x128xbf16>
    tpu.vector_store %arg5[%c0_9, %c0_10, %c0_11], %14 {strides = array<i32>} : memref<1x80x128xbf16, #tpu.memory_space<vmem>>, vector<1x80x128xbf16>,
    return
  }
  func.func @transform_0(%arg0: i32, %arg1: i32) -> (i32, i32, i32) {
    %c0_i32 = arith.constant 0 : i32
    %c0_i32_0 = arith.constant 0 : i32
    return %arg0, %arg1, %c0_i32 : i32, i32, i32
  }
  func.func @transform_1(%arg0: i32, %arg1: i32) -> (i32, i32, i32) {
    %c0_i32 = arith.constant 0 : i32
    %c0_i32_0 = arith.constant 0 : i32
    %c0_i32_1 = arith.constant 0 : i32
    return %arg0, %c0_i32, %c0_i32_0 : i32, i32, i32
  }
  func.func @transform_2(%arg0: i32, %arg1: i32) -> (i32, i32, i32) {
    %c0_i32 = arith.constant 0 : i32
    %c0_i32_0 = arith.constant 0 : i32
    %c0_i32_1 = arith.constant 0 : i32
    return %arg0, %c0_i32, %c0_i32_0 : i32, i32, i32
  }
  func.func @transform_3(%arg0: i32, %arg1: i32) -> (i32, i32, i32) {
    %c0_i32 = arith.constant 0 : i32
    %c0_i32_0 = arith.constant 0 : i32
    return %arg0, %arg1, %c0_i32 : i32, i32, i32
  }
}

module attributes {stable_mosaic.version = 11 : i64} {
  func.func @_deconv_block_kernel(%arg0: i32, %arg1: i32, %arg2: memref<1x128x128xbf16, #tpu.memory_space<vmem>>, %arg3: memref<1x128x128xbf16, #tpu.memory_space<vmem>>, %arg4: memref<1x1x128xf32, #tpu.memory_space<vmem>>, %arg5: memref<1x128x128xbf16, #tpu.memory_space<vmem>>) attributes {dimension_semantics = [#tpu.dimension_semantics<parallel>, #tpu.dimension_semantics<parallel>], iteration_bounds = array<i64: 3, 1>, scalar_prefetch = 0 : i64, scratch_operands = 0 : i64, tpu.core_type = #tpu.core_type<tc>, window_params = [{transform_indices = @transform_0, window_bounds = array<i64: 1, 128, 128>}, {transform_indices = @transform_1, window_bounds = array<i64: 1, 128, 128>}, {transform_indices = @transform_2, window_bounds = array<i64: 1, 1, 128>}, {transform_indices = @transform_3, window_bounds = array<i64: 1, 128, 128>}]} {
    %c0 = arith.constant 0 : index
    %c0_0 = arith.constant 0 : index
    %c0_1 = arith.constant 0 : index
    %0 = vector.load %arg2[%c0, %c0_0, %c0_1] : memref<1x128x128xbf16, #tpu.memory_space<vmem>>, vector<1x128x128xbf16>
    %1 = vector.shape_cast %0 : vector<1x128x128xbf16> to vector<128x128xbf16>
    %c0_2 = arith.constant 0 : index
    %c0_3 = arith.constant 0 : index
    %c0_4 = arith.constant 0 : index
    %2 = vector.load %arg3[%c0_2, %c0_3, %c0_4] : memref<1x128x128xbf16, #tpu.memory_space<vmem>>, vector<1x128x128xbf16>
    %3 = vector.shape_cast %2 : vector<1x128x128xbf16> to vector<128x128xbf16>
    %cst = arith.constant dense<0.000000e+00> : vector<128x128xf32>
    %4 = tpu.matmul %1, %3, %cst {dimension_numbers = #tpu.dot_dimension_numbers<[1], [0], [0], [1], [0, 0, 1, 1], [], []>} : vector<128x128xbf16>, vector<128x128xbf16>, vector<128x128xf32> -> vector<128x128xf32>
    %c0_5 = arith.constant 0 : index
    %c0_6 = arith.constant 0 : index
    %c0_7 = arith.constant 0 : index
    %5 = vector.load %arg4[%c0_5, %c0_6, %c0_7] : memref<1x1x128xf32, #tpu.memory_space<vmem>>, vector<1x1x128xf32>
    %6 = vector.shape_cast %5 : vector<1x1x128xf32> to vector<1x128xf32>
    %7 = vector.broadcast %6 : vector<1x128xf32> to vector<128x128xf32>
    %8 = arith.addf %4, %7 : vector<128x128xf32>
    %9 = arith.truncf %8 : vector<128x128xf32> to vector<128x128xbf16>
    %c0_8 = arith.constant 0 : index
    %c0_9 = arith.constant 0 : index
    %c0_10 = arith.constant 0 : index
    %10 = vector.load %arg5[%c0_8, %c0_9, %c0_10] : memref<1x128x128xbf16, #tpu.memory_space<vmem>>, vector<1x128x128xbf16>
    %11 = vector.shape_cast %10 : vector<1x128x128xbf16> to vector<128x128xbf16>
    %12 = vector.shape_cast %9 : vector<128x128xbf16> to vector<1x128x128xbf16>
    tpu.vector_store %arg5[%c0_8, %c0_9, %c0_10], %12 {strides = array<i32>} : memref<1x128x128xbf16, #tpu.memory_space<vmem>>, vector<1x128x128xbf16>,
    return
  }
  func.func @transform_0(%arg0: i32, %arg1: i32) -> (i32, i32, i32) {
    %c0_i32 = arith.constant 0 : i32
    %c0_i32_0 = arith.constant 0 : i32
    return %arg0, %arg1, %c0_i32 : i32, i32, i32
  }
  func.func @transform_1(%arg0: i32, %arg1: i32) -> (i32, i32, i32) {
    %c0_i32 = arith.constant 0 : i32
    %c0_i32_0 = arith.constant 0 : i32
    %c0_i32_1 = arith.constant 0 : i32
    return %arg0, %c0_i32, %c0_i32_0 : i32, i32, i32
  }
  func.func @transform_2(%arg0: i32, %arg1: i32) -> (i32, i32, i32) {
    %c0_i32 = arith.constant 0 : i32
    %c0_i32_0 = arith.constant 0 : i32
    %c0_i32_1 = arith.constant 0 : i32
    return %arg0, %c0_i32, %c0_i32_0 : i32, i32, i32
  }
  func.func @transform_3(%arg0: i32, %arg1: i32) -> (i32, i32, i32) {
    %c0_i32 = arith.constant 0 : i32
    %c0_i32_0 = arith.constant 0 : i32
    return %arg0, %arg1, %c0_i32 : i32, i32, i32
  }
}

module attributes {stable_mosaic.version = 11 : i64} {
  func.func @_deconv_block_kernel(%arg0: i32, %arg1: i32, %arg2: memref<1x80x64xbf16, #tpu.memory_space<vmem>>, %arg3: memref<1x64x64xbf16, #tpu.memory_space<vmem>>, %arg4: memref<1x1x64xf32, #tpu.memory_space<vmem>>, %arg5: memref<1x80x64xbf16, #tpu.memory_space<vmem>>) attributes {dimension_semantics = [#tpu.dimension_semantics<parallel>, #tpu.dimension_semantics<parallel>], iteration_bounds = array<i64: 1, 1>, scalar_prefetch = 0 : i64, scratch_operands = 0 : i64, tpu.core_type = #tpu.core_type<tc>, window_params = [{transform_indices = @transform_0, window_bounds = array<i64: 1, 80, 64>}, {transform_indices = @transform_1, window_bounds = array<i64: 1, 64, 64>}, {transform_indices = @transform_2, window_bounds = array<i64: 1, 1, 64>}, {transform_indices = @transform_3, window_bounds = array<i64: 1, 80, 64>}]} {
    %c0 = arith.constant 0 : index
    %c0_0 = arith.constant 0 : index
    %c0_1 = arith.constant 0 : index
    %0 = vector.load %arg2[%c0, %c0_0, %c0_1] : memref<1x80x64xbf16, #tpu.memory_space<vmem>>, vector<1x80x64xbf16>
    %1 = vector.shape_cast %0 : vector<1x80x64xbf16> to vector<80x64xbf16>
    %c0_2 = arith.constant 0 : index
    %c0_3 = arith.constant 0 : index
    %c0_4 = arith.constant 0 : index
    %2 = vector.load %arg3[%c0_2, %c0_3, %c0_4] : memref<1x64x64xbf16, #tpu.memory_space<vmem>>, vector<1x64x64xbf16>
    %3 = vector.shape_cast %2 : vector<1x64x64xbf16> to vector<64x64xbf16>
    %cst = arith.constant dense<0.000000e+00> : vector<80x64xf32>
    %4 = tpu.matmul %1, %3, %cst {dimension_numbers = #tpu.dot_dimension_numbers<[1], [0], [0], [1], [0, 0, 1, 1], [], []>} : vector<80x64xbf16>, vector<64x64xbf16>, vector<80x64xf32> -> vector<80x64xf32>
    %c0_5 = arith.constant 0 : index
    %c0_6 = arith.constant 0 : index
    %c0_7 = arith.constant 0 : index
    %5 = vector.load %arg4[%c0_5, %c0_6, %c0_7] : memref<1x1x64xf32, #tpu.memory_space<vmem>>, vector<1x1x64xf32>
    %6 = vector.shape_cast %5 : vector<1x1x64xf32> to vector<1x64xf32>
    %7 = vector.broadcast %6 : vector<1x64xf32> to vector<80x64xf32>
    %8 = arith.addf %4, %7 : vector<80x64xf32>
    %cst_8 = arith.constant 0.000000e+00 : f32
    %9 = vector.broadcast %cst_8 : f32 to vector<80x64xf32>
    %10 = arith.maximumf %8, %9 : vector<80x64xf32>
    %11 = arith.truncf %10 : vector<80x64xf32> to vector<80x64xbf16>
    %c0_9 = arith.constant 0 : index
    %c0_10 = arith.constant 0 : index
    %c0_11 = arith.constant 0 : index
    %12 = vector.load %arg5[%c0_9, %c0_10, %c0_11] : memref<1x80x64xbf16, #tpu.memory_space<vmem>>, vector<1x80x64xbf16>
    %13 = vector.shape_cast %12 : vector<1x80x64xbf16> to vector<80x64xbf16>
    %14 = vector.shape_cast %11 : vector<80x64xbf16> to vector<1x80x64xbf16>
    tpu.vector_store %arg5[%c0_9, %c0_10, %c0_11], %14 {strides = array<i32>} : memref<1x80x64xbf16, #tpu.memory_space<vmem>>, vector<1x80x64xbf16>,
    return
  }
  func.func @transform_0(%arg0: i32, %arg1: i32) -> (i32, i32, i32) {
    %c0_i32 = arith.constant 0 : i32
    %c0_i32_0 = arith.constant 0 : i32
    return %arg0, %arg1, %c0_i32 : i32, i32, i32
  }
  func.func @transform_1(%arg0: i32, %arg1: i32) -> (i32, i32, i32) {
    %c0_i32 = arith.constant 0 : i32
    %c0_i32_0 = arith.constant 0 : i32
    %c0_i32_1 = arith.constant 0 : i32
    return %arg0, %c0_i32, %c0_i32_0 : i32, i32, i32
  }
  func.func @transform_2(%arg0: i32, %arg1: i32) -> (i32, i32, i32) {
    %c0_i32 = arith.constant 0 : i32
    %c0_i32_0 = arith.constant 0 : i32
    %c0_i32_1 = arith.constant 0 : i32
    return %arg0, %c0_i32, %c0_i32_0 : i32, i32, i32
  }
  func.func @transform_3(%arg0: i32, %arg1: i32) -> (i32, i32, i32) {
    %c0_i32 = arith.constant 0 : i32
    %c0_i32_0 = arith.constant 0 : i32
    return %arg0, %arg1, %c0_i32 : i32, i32, i32
  }
}

module attributes {stable_mosaic.version = 11 : i64} {
  func.func @_deconv_block_kernel(%arg0: i32, %arg1: i32, %arg2: memref<1x128x64xbf16, #tpu.memory_space<vmem>>, %arg3: memref<1x64x64xbf16, #tpu.memory_space<vmem>>, %arg4: memref<1x1x64xf32, #tpu.memory_space<vmem>>, %arg5: memref<1x128x64xbf16, #tpu.memory_space<vmem>>) attributes {dimension_semantics = [#tpu.dimension_semantics<parallel>, #tpu.dimension_semantics<parallel>], iteration_bounds = array<i64: 1, 1>, scalar_prefetch = 0 : i64, scratch_operands = 0 : i64, tpu.core_type = #tpu.core_type<tc>, window_params = [{transform_indices = @transform_0, window_bounds = array<i64: 1, 128, 64>}, {transform_indices = @transform_1, window_bounds = array<i64: 1, 64, 64>}, {transform_indices = @transform_2, window_bounds = array<i64: 1, 1, 64>}, {transform_indices = @transform_3, window_bounds = array<i64: 1, 128, 64>}]} {
    %c0 = arith.constant 0 : index
    %c0_0 = arith.constant 0 : index
    %c0_1 = arith.constant 0 : index
    %0 = vector.load %arg2[%c0, %c0_0, %c0_1] : memref<1x128x64xbf16, #tpu.memory_space<vmem>>, vector<1x128x64xbf16>
    %1 = vector.shape_cast %0 : vector<1x128x64xbf16> to vector<128x64xbf16>
    %c0_2 = arith.constant 0 : index
    %c0_3 = arith.constant 0 : index
    %c0_4 = arith.constant 0 : index
    %2 = vector.load %arg3[%c0_2, %c0_3, %c0_4] : memref<1x64x64xbf16, #tpu.memory_space<vmem>>, vector<1x64x64xbf16>
    %3 = vector.shape_cast %2 : vector<1x64x64xbf16> to vector<64x64xbf16>
    %cst = arith.constant dense<0.000000e+00> : vector<128x64xf32>
    %4 = tpu.matmul %1, %3, %cst {dimension_numbers = #tpu.dot_dimension_numbers<[1], [0], [0], [1], [0, 0, 1, 1], [], []>} : vector<128x64xbf16>, vector<64x64xbf16>, vector<128x64xf32> -> vector<128x64xf32>
    %c0_5 = arith.constant 0 : index
    %c0_6 = arith.constant 0 : index
    %c0_7 = arith.constant 0 : index
    %5 = vector.load %arg4[%c0_5, %c0_6, %c0_7] : memref<1x1x64xf32, #tpu.memory_space<vmem>>, vector<1x1x64xf32>
    %6 = vector.shape_cast %5 : vector<1x1x64xf32> to vector<1x64xf32>
    %7 = vector.broadcast %6 : vector<1x64xf32> to vector<128x64xf32>
    %8 = arith.addf %4, %7 : vector<128x64xf32>
    %9 = arith.truncf %8 : vector<128x64xf32> to vector<128x64xbf16>
    %c0_8 = arith.constant 0 : index
    %c0_9 = arith.constant 0 : index
    %c0_10 = arith.constant 0 : index
    %10 = vector.load %arg5[%c0_8, %c0_9, %c0_10] : memref<1x128x64xbf16, #tpu.memory_space<vmem>>, vector<1x128x64xbf16>
    %11 = vector.shape_cast %10 : vector<1x128x64xbf16> to vector<128x64xbf16>
    %12 = vector.shape_cast %9 : vector<128x64xbf16> to vector<1x128x64xbf16>
    tpu.vector_store %arg5[%c0_8, %c0_9, %c0_10], %12 {strides = array<i32>} : memref<1x128x64xbf16, #tpu.memory_space<vmem>>, vector<1x128x64xbf16>,
    return
  }
  func.func @transform_0(%arg0: i32, %arg1: i32) -> (i32, i32, i32) {
    %c0_i32 = arith.constant 0 : i32
    %c0_i32_0 = arith.constant 0 : i32
    return %arg0, %arg1, %c0_i32 : i32, i32, i32
  }
  func.func @transform_1(%arg0: i32, %arg1: i32) -> (i32, i32, i32) {
    %c0_i32 = arith.constant 0 : i32
    %c0_i32_0 = arith.constant 0 : i32
    %c0_i32_1 = arith.constant 0 : i32
    return %arg0, %c0_i32, %c0_i32_0 : i32, i32, i32
  }
  func.func @transform_2(%arg0: i32, %arg1: i32) -> (i32, i32, i32) {
    %c0_i32 = arith.constant 0 : i32
    %c0_i32_0 = arith.constant 0 : i32
    %c0_i32_1 = arith.constant 0 : i32
    return %arg0, %c0_i32, %c0_i32_0 : i32, i32, i32
  }
  func.func @transform_3(%arg0: i32, %arg1: i32) -> (i32, i32, i32) {
    %c0_i32 = arith.constant 0 : i32
    %c0_i32_0 = arith.constant 0 : i32
    return %arg0, %arg1, %c0_i32 : i32, i32, i32
  }
}

module attributes {stable_mosaic.version = 11 : i64} {
  func.func @_deconv_block_kernel(%arg0: i32, %arg1: i32, %arg2: memref<1x128x32xbf16, #tpu.memory_space<vmem>>, %arg3: memref<1x32x32xbf16, #tpu.memory_space<vmem>>, %arg4: memref<1x1x32xf32, #tpu.memory_space<vmem>>, %arg5: memref<1x128x32xbf16, #tpu.memory_space<vmem>>) attributes {dimension_semantics = [#tpu.dimension_semantics<parallel>, #tpu.dimension_semantics<parallel>], iteration_bounds = array<i64: 1, 1>, scalar_prefetch = 0 : i64, scratch_operands = 0 : i64, tpu.core_type = #tpu.core_type<tc>, window_params = [{transform_indices = @transform_0, window_bounds = array<i64: 1, 128, 32>}, {transform_indices = @transform_1, window_bounds = array<i64: 1, 32, 32>}, {transform_indices = @transform_2, window_bounds = array<i64: 1, 1, 32>}, {transform_indices = @transform_3, window_bounds = array<i64: 1, 128, 32>}]} {
    %c0 = arith.constant 0 : index
    %c0_0 = arith.constant 0 : index
    %c0_1 = arith.constant 0 : index
    %0 = vector.load %arg2[%c0, %c0_0, %c0_1] : memref<1x128x32xbf16, #tpu.memory_space<vmem>>, vector<1x128x32xbf16>
    %1 = vector.shape_cast %0 : vector<1x128x32xbf16> to vector<128x32xbf16>
    %c0_2 = arith.constant 0 : index
    %c0_3 = arith.constant 0 : index
    %c0_4 = arith.constant 0 : index
    %2 = vector.load %arg3[%c0_2, %c0_3, %c0_4] : memref<1x32x32xbf16, #tpu.memory_space<vmem>>, vector<1x32x32xbf16>
    %3 = vector.shape_cast %2 : vector<1x32x32xbf16> to vector<32x32xbf16>
    %cst = arith.constant dense<0.000000e+00> : vector<128x32xf32>
    %4 = tpu.matmul %1, %3, %cst {dimension_numbers = #tpu.dot_dimension_numbers<[1], [0], [0], [1], [0, 0, 1, 1], [], []>} : vector<128x32xbf16>, vector<32x32xbf16>, vector<128x32xf32> -> vector<128x32xf32>
    %c0_5 = arith.constant 0 : index
    %c0_6 = arith.constant 0 : index
    %c0_7 = arith.constant 0 : index
    %5 = vector.load %arg4[%c0_5, %c0_6, %c0_7] : memref<1x1x32xf32, #tpu.memory_space<vmem>>, vector<1x1x32xf32>
    %6 = vector.shape_cast %5 : vector<1x1x32xf32> to vector<1x32xf32>
    %7 = vector.broadcast %6 : vector<1x32xf32> to vector<128x32xf32>
    %8 = arith.addf %4, %7 : vector<128x32xf32>
    %9 = arith.truncf %8 : vector<128x32xf32> to vector<128x32xbf16>
    %c0_8 = arith.constant 0 : index
    %c0_9 = arith.constant 0 : index
    %c0_10 = arith.constant 0 : index
    %10 = vector.load %arg5[%c0_8, %c0_9, %c0_10] : memref<1x128x32xbf16, #tpu.memory_space<vmem>>, vector<1x128x32xbf16>
    %11 = vector.shape_cast %10 : vector<1x128x32xbf16> to vector<128x32xbf16>
    %12 = vector.shape_cast %9 : vector<128x32xbf16> to vector<1x128x32xbf16>
    tpu.vector_store %arg5[%c0_8, %c0_9, %c0_10], %12 {strides = array<i32>} : memref<1x128x32xbf16, #tpu.memory_space<vmem>>, vector<1x128x32xbf16>,
    return
  }
  func.func @transform_0(%arg0: i32, %arg1: i32) -> (i32, i32, i32) {
    %c0_i32 = arith.constant 0 : i32
    %c0_i32_0 = arith.constant 0 : i32
    return %arg0, %arg1, %c0_i32 : i32, i32, i32
  }
  func.func @transform_1(%arg0: i32, %arg1: i32) -> (i32, i32, i32) {
    %c0_i32 = arith.constant 0 : i32
    %c0_i32_0 = arith.constant 0 : i32
    %c0_i32_1 = arith.constant 0 : i32
    return %arg0, %c0_i32, %c0_i32_0 : i32, i32, i32
  }
  func.func @transform_2(%arg0: i32, %arg1: i32) -> (i32, i32, i32) {
    %c0_i32 = arith.constant 0 : i32
    %c0_i32_0 = arith.constant 0 : i32
    %c0_i32_1 = arith.constant 0 : i32
    return %arg0, %c0_i32, %c0_i32_0 : i32, i32, i32
  }
  func.func @transform_3(%arg0: i32, %arg1: i32) -> (i32, i32, i32) {
    %c0_i32 = arith.constant 0 : i32
    %c0_i32_0 = arith.constant 0 : i32
    return %arg0, %arg1, %c0_i32 : i32, i32, i32
  }
}

module attributes {stable_mosaic.version = 11 : i64} {
  func.func @_concat_conv_kernel(%arg0: i32, %arg1: memref<2x120xbf16, #tpu.memory_space<vmem>>, %arg2: memref<120x512xbf16, #tpu.memory_space<vmem>>, %arg3: memref<2x1xf32, #tpu.memory_space<vmem>>, %arg4: memref<2x512xf32, #tpu.memory_space<vmem>>) attributes {dimension_semantics = [#tpu.dimension_semantics<parallel>], iteration_bounds = array<i64: 1>, scalar_prefetch = 0 : i64, scratch_operands = 0 : i64, tpu.core_type = #tpu.core_type<tc>, window_params = [{pipeline_mode = #tpu.pipeline_mode<synchronous>, transform_indices = @transform_0, window_bounds = array<i64: 2, 120>}, {transform_indices = @transform_1, window_bounds = array<i64: 120, 512>}, {pipeline_mode = #tpu.pipeline_mode<synchronous>, transform_indices = @transform_2, window_bounds = array<i64: 2, 1>}, {transform_indices = @transform_3, window_bounds = array<i64: 2, 512>}]} {
    %c0 = arith.constant 0 : index
    %c0_0 = arith.constant 0 : index
    %0 = vector.load %arg1[%c0, %c0_0] : memref<2x120xbf16, #tpu.memory_space<vmem>>, vector<2x120xbf16>
    %c0_1 = arith.constant 0 : index
    %c0_2 = arith.constant 0 : index
    %1 = vector.load %arg2[%c0_1, %c0_2] : memref<120x512xbf16, #tpu.memory_space<vmem>>, vector<120x512xbf16>
    %cst = arith.constant dense<0.000000e+00> : vector<2x512xf32>
    %2 = tpu.matmul %0, %1, %cst {dimension_numbers = #tpu.dot_dimension_numbers<[1], [0], [0], [1], [0, 0, 1, 1], [], []>} : vector<2x120xbf16>, vector<120x512xbf16>, vector<2x512xf32> -> vector<2x512xf32>
    %c0_3 = arith.constant 0 : index
    %c0_4 = arith.constant 0 : index
    %3 = vector.load %arg3[%c0_3, %c0_4] : memref<2x1xf32, #tpu.memory_space<vmem>>, vector<2x1xf32>
    %4 = vector.broadcast %3 : vector<2x1xf32> to vector<2x512xf32>
    %5 = arith.addf %2, %4 : vector<2x512xf32>
    %c0_5 = arith.constant 0 : index
    %c0_6 = arith.constant 0 : index
    %6 = vector.load %arg4[%c0_5, %c0_6] : memref<2x512xf32, #tpu.memory_space<vmem>>, vector<2x512xf32>
    tpu.vector_store %arg4[%c0_5, %c0_6], %5 {strides = array<i32>} : memref<2x512xf32, #tpu.memory_space<vmem>>, vector<2x512xf32>,
    return
  }
  func.func @transform_0(%arg0: i32) -> (i32, i32) {
    %c0_i32 = arith.constant 0 : i32
    %c0_i32_0 = arith.constant 0 : i32
    %c0_i32_1 = arith.constant 0 : i32
    return %c0_i32, %c0_i32_0 : i32, i32
  }
  func.func @transform_1(%arg0: i32) -> (i32, i32) {
    %c0_i32 = arith.constant 0 : i32
    %c0_i32_0 = arith.constant 0 : i32
    return %c0_i32, %arg0 : i32, i32
  }
  func.func @transform_2(%arg0: i32) -> (i32, i32) {
    %c0_i32 = arith.constant 0 : i32
    %c0_i32_0 = arith.constant 0 : i32
    %c0_i32_1 = arith.constant 0 : i32
    return %c0_i32, %c0_i32_0 : i32, i32
  }
  func.func @transform_3(%arg0: i32) -> (i32, i32) {
    %c0_i32 = arith.constant 0 : i32
    %c0_i32_0 = arith.constant 0 : i32
    return %c0_i32, %arg0 : i32, i32
  }
}

module attributes {stable_mosaic.version = 11 : i64} {
  func.func @_softmax_rows_kernel(%arg0: i32, %arg1: memref<80x19xf32, #tpu.memory_space<vmem>>, %arg2: memref<80x19xf32, #tpu.memory_space<vmem>>) attributes {dimension_semantics = [#tpu.dimension_semantics<parallel>], iteration_bounds = array<i64: 1>, scalar_prefetch = 0 : i64, scratch_operands = 0 : i64, tpu.core_type = #tpu.core_type<tc>, window_params = [{transform_indices = @transform_0, window_bounds = array<i64: 80, 19>}, {transform_indices = @transform_1, window_bounds = array<i64: 80, 19>}]} {
    %c0 = arith.constant 0 : index
    %c0_0 = arith.constant 0 : index
    %0 = vector.load %arg1[%c0, %c0_0] : memref<80x19xf32, #tpu.memory_space<vmem>>, vector<80x19xf32>
    %cst = arith.constant dense<0xFF800000> : vector<80xf32>
    %1 = vector.multi_reduction <maximumf>, %0, %cst [1] : vector<80x19xf32> to vector<80xf32>
    %2 = vector.shape_cast %1 : vector<80xf32> to vector<80x1xf32>
    %3 = vector.broadcast %2 : vector<80x1xf32> to vector<80x19xf32>
    %4 = arith.subf %0, %3 : vector<80x19xf32>
    %5 = math.exp %4 : vector<80x19xf32>
    %cst_1 = arith.constant dense<0.000000e+00> : vector<80xf32>
    %6 = vector.multi_reduction <add>, %5, %cst_1 [1] : vector<80x19xf32> to vector<80xf32>
    %7 = vector.shape_cast %6 : vector<80xf32> to vector<80x1xf32>
    %8 = tpu.reciprocal %7 {approx = true} : vector<80x1xf32> -> vector<80x1xf32>
    %9 = vector.broadcast %8 : vector<80x1xf32> to vector<80x19xf32>
    %10 = arith.mulf %5, %9 : vector<80x19xf32>
    %c0_2 = arith.constant 0 : index
    %c0_3 = arith.constant 0 : index
    %11 = vector.load %arg2[%c0_2, %c0_3] : memref<80x19xf32, #tpu.memory_space<vmem>>, vector<80x19xf32>
    tpu.vector_store %arg2[%c0_2, %c0_3], %10 {strides = array<i32>} : memref<80x19xf32, #tpu.memory_space<vmem>>, vector<80x19xf32>,
    return
  }
  func.func @transform_0(%arg0: i32) -> (i32, i32) {
    %c0_i32 = arith.constant 0 : i32
    %c0_i32_0 = arith.constant 0 : i32
    return %arg0, %c0_i32 : i32, i32
  }
  func.func @transform_1(%arg0: i32) -> (i32, i32) {
    %c0_i32 = arith.constant 0 : i32
    %c0_i32_0 = arith.constant 0 : i32
    return %arg0, %c0_i32 : i32, i32
  }
}

</mosaic_0001>

<bundles_post_ra>
// kernel: tile.63
= control target key start
LH: loop header
LB: loop body
LE: loop exit
PB: predicated region body
PF: predicated region fallthrough
CT: control target
= control target key end

     0   :  { %s22_s0 = inlined_call_operand.vmem [shape: f32[32], index: 0, kind: input, shape index: {}]   ;;  %s23_s1 = inlined_call_operand.vmem [shape: f32[4,32], index: 1, kind: output, shape index: {}]  }
   0x1   :  { %v4_v0 = vld [vmem:[%s22_s0] ss:$0 sm:$0xff] }
   0x2   :  { %5 = vst [vmem:[%s23_s1] sm:$0xf] %v4_v0 }

// kernel: tile.72
= control target key start
LH: loop header
LB: loop body
LE: loop exit
PB: predicated region body
PF: predicated region fallthrough
CT: control target
= control target key end

     0   :  { %s37_s8 = smov 32   ;;  %s38_s9 = smov 64   ;;  %vm7_vm0 = vcmask 261120   ;;  %vm13_vm1 = vcmask 1048320   ;;  %vm19_vm2 = vcmask 785920   ;;  %vm25_vm3 = vcmask 523520   ;;  %s55_s0 = inlined_call_operand.vmem [shape: f32[4,32], index: 0, kind: input, shape index: {}]   ;;  %s56_s1 = inlined_call_operand.vmem [shape: f32[1,1,128], index: 1, kind: output, shape index: {}]  }
   0x1   :  { %v4_v0 = vld [vmem:[%s55_s0] sm:$0xf]  ;;  %s36_s0 = smov 96  }
   0x2   :  { %5 = vst [vmem:[#allocation1] sm:$0xf] %v4_v0 }
   0x9   :  { %v10_v1 = vld [vmem:[#allocation1 + $0x3] sm:$0x1]   ;;  %v22_v2 = vld [vmem:[#allocation1 + $0x1] sm:$0x1]   ;;  %v16_v3 = vld [vmem:[#allocation1 + $0x2] sm:$0x1]  }
   0xa   :  { %11 = vrot.lane.b32.xlu0 %v10_v1, %s36_s0  ;;  %23 = vrot.lane.b32.xlu1 %v22_v2, %s37_s8  ;;  %v6_v4 = vld [vmem:[#allocation1] sm:$0x1]  }
   0xb   :  { %8 = vst.msk [vmem:[#allocation0] sm:$0x1] %vm7_vm0, %v6_v4  }
  0x12   :  { %17 = vrot.lane.b32.xlu0 %v16_v3, %s38_s9 }
  0x7c   :  { %v12_v5 = vpop.permute.xlu0 %11   ;;  %v24_v6 = vpop.permute.xlu1 %23  }
  0x7d   :  { %14 = vst.msk [vmem:[#allocation0] sm:$0x1] %vm13_vm1, %v12_v5  }
  0x84   :  { %v18_v7 = vpop.permute.xlu0 %17  }
  0x85   :  { %20 = vst.msk [vmem:[#allocation0] sm:$0x1] %vm19_vm2, %v18_v7  }
  0x86   :  { %26 = vst.msk [vmem:[#allocation0] sm:$0x1] %vm25_vm3, %v24_v6  }
  0x8d   :  { %v29_v8 = vld [vmem:[#allocation0] sm:$0x1] }
  0x8e   :  { %32 = vst [vmem:[%s56_s1] sm:$0x1] %v29_v8 }

// kernel: decoder_recovery_forward.8
= control target key start
LH: loop header
LB: loop body
LE: loop exit
PB: predicated region body
PF: predicated region fallthrough
CT: control target
= control target key end

     0   :  { %s697_s12 = smov 0   ;;  %s699_s13 = smov 0   ;;  %s760_s0 = inlined_call_operand.vmem [shape: bf16[3,64,128], index: 0, kind: input, shape index: {}]   ;;  %s761_s1 = inlined_call_operand.vmem [shape: bf16[3,128,128], index: 1, kind: input, shape index: {}]   ;;  %s762_s2 = inlined_call_operand.vmem [shape: f32[3,1,128], index: 2, kind: input, shape index: {}]   ;;  %s763_s3 = inlined_call_operand.vmem [shape: bf16[3,64,128], index: 3, kind: output, shape index: {}]  }
   0x1   :  { %s701_s14 = smov 0  }
   0x2 LB: > { %s25_s15 = sadd.s32 1, %s671_s13  ;;  %p509_p0 = scmp.ge.s32.totalorder %s675_s14, 1  ;;  %s675_s14 = sphi %s701_s14, %s13_s14   ;;  %s671_s13 = sphi %s699_s13, %s765_s13   ;;  %s667_s12 = sphi %s697_s12, %s764_s12  }
   0x3   : > { %p27_p1 = scmp.ge.s32.totalorder %s25_s15, 3  ;;  %p176_p2 = scmp.lt.s32.totalorder %s675_s14, 4 }
   0x5   : > { %s767_s15 = smov (%p27_p1, %s25_s15), 0  ;;  %p177_p3 = pnand %p509_p0, %p176_p2 }
   0x6   : > { %p217_p4 = scmp.lt.s32.totalorder (!%p177_p3), %s667_s12, 2 }
   0x7   : > { %180 = sbr.rel (%p177_p3) target bundleno = 196 (0xc4), region = 32 }
   0xc   : > { %s769_s12 = smov (!%p217_p4, %s667_s12), 2 }
   0xd   : > { %s567_s16 = sshll.u32 %s769_s12, 6  ;;  %s233_s22 = scalar_lea.vmem %s762_s2, %s769_s12 }
   0xe   : > { %s721_s19 = scalar_lea.vmem %s761_s1, %s567_s16  ;;  %s566_s23 = sshll.u32 %s769_s12, 5  ;;  %v652_v14 = vld [vmem:[%s233_s22] ss:$0 sm:$0xff] }
   0xf   : > { %v580_v0 = vld [vmem:[%s721_s19 + $0x38] sm:$0xff]  ;;  %v579_v1 = vld [vmem:[%s721_s19 + $0x30] sm:$0xff]  ;;  %v578_v2 = vld [vmem:[%s721_s19 + $0x28] sm:$0xff]  ;;  %s224_s26 = scalar_lea.vmem %s760_s0, %s566_s23  ;;  %s242_s4 = scalar_lea.vmem %s763_s3, %s566_s23 }
  0x10   : > { %344 = vmatpush.bf16.msra.mxu0 %v580_v0  ;;  %604 = vmatpush.bf16.msra.mxu1 %v580_v0  ;;  %v577_v3 = vld [vmem:[%s721_s19 + $0x20] sm:$0xff]  ;;  %v576_v4 = vld [vmem:[%s721_s19 + $0x18] sm:$0xff]  ;;  %v575_v5 = vld [vmem:[%s721_s19 + $0x10] sm:$0xff] }
  0x11   : > { %605 = vmatpush.bf16.msra.mxu2 %v580_v0  ;;  %606 = vmatpush.bf16.msra.mxu3 %v580_v0  ;;  %v574_v6 = vld [vmem:[%s721_s19 + $0x8] sm:$0xff]  ;;  %v573_v7 = vld [vmem:[%s721_s19] sm:$0xff]  ;;  %v571_v10 = vld [vmem:[%s224_s26 + $0x10] sm:$0xff] }
  0x12   : > { %v569_v8 = vld [vmem:[%s224_s26] sm:$0xff]  ;;  %v570_v9 = vld [vmem:[%s224_s26 + $0x8] sm:$0xff]  ;;  %v572_v11 = vld [vmem:[%s224_s26 + $0x18] sm:$0xff] }
  0x14   : > { %345 = vmatpush.bf16.msra.mxu0 %v579_v1  ;;  %607 = vmatpush.bf16.msra.mxu1 %v579_v1 }
  0x15   : > { %608 = vmatpush.bf16.msra.mxu2 %v579_v1  ;;  %609 = vmatpush.bf16.msra.mxu3 %v579_v1 }
  0x18   : > { %346 = vmatpush.bf16.msra.mxu0 %v578_v2  ;;  %610 = vmatpush.bf16.msra.mxu1 %v578_v2 }
  0x19   : > { %611 = vmatpush.bf16.msra.mxu2 %v578_v2  ;;  %612 = vmatpush.bf16.msra.mxu3 %v578_v2 }
  0x1c   : > { %347 = vmatpush.bf16.msra.mxu0 %v577_v3  ;;  %613 = vmatpush.bf16.msra.mxu1 %v577_v3 }
  0x1d   : > { %614 = vmatpush.bf16.msra.mxu2 %v577_v3  ;;  %615 = vmatpush.bf16.msra.mxu3 %v577_v3 }
  0x20   : > { %348 = vmatpush.bf16.msra.mxu0 %v576_v4  ;;  %616 = vmatpush.bf16.msra.mxu1 %v576_v4 }
  0x21   : > { %617 = vmatpush.bf16.msra.mxu2 %v576_v4  ;;  %618 = vmatpush.bf16.msra.mxu3 %v576_v4 }
  0x24   : > { %349 = vmatpush.bf16.msra.mxu0 %v575_v5  ;;  %619 = vmatpush.bf16.msra.mxu1 %v575_v5 }
  0x25   : > { %620 = vmatpush.bf16.msra.mxu2 %v575_v5  ;;  %621 = vmatpush.bf16.msra.mxu3 %v575_v5 }
  0x28   : > { %350 = vmatpush.bf16.msra.mxu0 %v574_v6  ;;  %622 = vmatpush.bf16.msra.mxu1 %v574_v6 }
  0x29   : > { %623 = vmatpush.bf16.msra.mxu2 %v574_v6  ;;  %624 = vmatpush.bf16.msra.mxu3 %v574_v6 }
  0x2c   : > { %351 = vmatpush.bf16.msra.mxu0 %v573_v7  ;;  %625 = vmatpush.bf16.msra.mxu1 %v573_v7 }
  0x2d   : > { %626 = vmatpush.bf16.msra.mxu2 %v573_v7  ;;  %627 = vmatpush.bf16.msra.mxu3 %v573_v7 }
  0x2f   : > { %352 = vmatmul.bf16.vlgmr.msra.gmra.mxu0 %v569_v8  ;;  %357 = vmatmul.bf16.vlgmr.msra.gmra.mxu1 %v570_v9 }
  0x30   : > { %362 = vmatmul.bf16.vlgmr.msra.gmra.mxu2 %v571_v10  ;;  %367 = vmatmul.bf16.vlgmr.msra.gmra.mxu3 %v572_v11 }
  0xac   : > { %v353_v12 = vpop.f32.mrf.mxu0  ;;  %v358_v13 = vpop.f32.mrf.mxu1 }
  0xad   : > { %v354_v15 = vadd.f32 %v652_v14, %v353_v12  ;;  %v359_v16 = vadd.f32 %v652_v14, %v358_v13 }
  0xaf   : > { %v373_v23 = vmax.f32 %v354_v15, 0.0  ;;  %v375_v24 = vmax.f32 %v359_v16, 0.0 }
  0xb3   : > { %v363_v17 = vpop.f32.mrf.mxu2  ;;  %v368_v18 = vpop.f32.mrf.mxu3 }
  0xb4   : > { %v355_v19 = vpop.f32.mrf.mxu0  ;;  %v360_v20 = vpop.f32.mrf.mxu1  ;;  %v364_v29 = vadd.f32 %v652_v14, %v363_v17  ;;  %v369_v30 = vadd.f32 %v652_v14, %v368_v18 }
  0xb5   : > { %v356_v21 = vadd.f32 %v652_v14, %v355_v19  ;;  %v361_v22 = vadd.f32 %v652_v14, %v360_v20 }
  0xb6   : > { %v377_v35 = vmax.f32 %v364_v29, 0.0  ;;  %v379_v36 = vmax.f32 %v369_v30, 0.0 }
  0xb7   : > { %v374_v25 = vmax.f32 %v356_v21, 0.0  ;;  %v376_v26 = vmax.f32 %v361_v22, 0.0 }
  0xb9   : > { %v584_v27 = vpack.c.bf16 %v374_v25, %v373_v23  ;;  %v589_v28 = vpack.c.bf16 %v376_v26, %v375_v24 }
  0xbb   : > { %585 = vst [vmem:[%s242_s4] sm:$0xff] %v584_v27   ;;  %v365_v31 = vpop.f32.mrf.mxu2  ;;  %v370_v32 = vpop.f32.mrf.mxu3 }
  0xbc   : > { %601 = vst [vmem:[%s242_s4 + $0x8] sm:$0xff] %v589_v28   ;;  %v366_v33 = vadd.f32 %v652_v14, %v365_v31  ;;  %v371_v34 = vadd.f32 %v652_v14, %v370_v32 }
  0xbe   : > { %v378_v37 = vmax.f32 %v366_v33, 0.0  ;;  %v380_v38 = vmax.f32 %v371_v34, 0.0 }
  0xc0   : > { %v594_v39 = vpack.c.bf16 %v378_v37, %v377_v35  ;;  %v599_v40 = vpack.c.bf16 %v380_v38, %v379_v36 }
  0xc2   : > { %602 = vst [vmem:[%s242_s4 + $0x10] sm:$0xff] %v594_v39  }
  0xc3   : > { %603 = vst [vmem:[%s242_s4 + $0x18] sm:$0xff] %v599_v40  }
  0xc4 PF: > { %s13_s14 = sadd.s32 1, %s675_s14   ;;  %s764_s12 = smov %s671_s13 }
  0xc5   : > { %p10_p5 = scmp.ge.s32.totalorder %s13_s14, 5   ;;  %s765_s13 = smov %s767_s15 }
  0xc7   :  { %12 = sbr.rel (!%p10_p5) target bundleno = 2 (0x2), region = 68 }

// kernel: decoder_recovery_forward.9
= control target key start
LH: loop header
LB: loop body
LE: loop exit
PB: predicated region body
PF: predicated region fallthrough
CT: control target
= control target key end

     0   :  { %s724_s12 = smov 0   ;;  %s726_s13 = smov 0   ;;  %s787_s0 = inlined_call_operand.vmem [shape: bf16[3,80,128], index: 0, kind: input, shape index: {}]   ;;  %s788_s1 = inlined_call_operand.vmem [shape: bf16[3,128,128], index: 1, kind: input, shape index: {}]   ;;  %s789_s2 = inlined_call_operand.vmem [shape: f32[3,1,128], index: 2, kind: input, shape index: {}]   ;;  %s790_s3 = inlined_call_operand.vmem [shape: bf16[3,80,128], index: 3, kind: output, shape index: {}]  }
   0x1   :  { %s728_s14 = smov 0  }
   0x2 LB: > { %s25_s15 = sadd.s32 1, %s698_s13  ;;  %p528_p0 = scmp.ge.s32.totalorder %s702_s14, 1  ;;  %s702_s14 = sphi %s728_s14, %s13_s14   ;;  %s698_s13 = sphi %s726_s13, %s792_s13   ;;  %s694_s12 = sphi %s724_s12, %s791_s12  }
   0x3   : > { %p27_p1 = scmp.ge.s32.totalorder %s25_s15, 3  ;;  %p176_p2 = scmp.lt.s32.totalorder %s702_s14, 4 }
   0x5   : > { %s794_s15 = smov (%p27_p1, %s25_s15), 0  ;;  %p177_p3 = pnand %p528_p0, %p176_p2 }
   0x6   : > { %p217_p4 = scmp.lt.s32.totalorder (!%p177_p3), %s694_s12, 2 }
   0x7   : > { %180 = sbr.rel (%p177_p3) target bundleno = 210 (0xd2), region = 32 }
   0xc   : > { %s796_s12 = smov (!%p217_p4, %s694_s12), 2 }
   0xd   : > { %s587_s16 = sshll.u32 %s796_s12, 6  ;;  %s233_s22 = scalar_lea.vmem %s789_s2, %s796_s12 }
   0xe   : > { %s748_s19 = scalar_lea.vmem %s788_s1, %s587_s16  ;;  %s654_s23 = smul.u32 40, %s796_s12  ;;  %v679_v15 = vld [vmem:[%s233_s22] ss:$0 sm:$0xff] }
   0xf   : > { %v600_v0 = vld [vmem:[%s748_s19 + $0x38] sm:$0xff]  ;;  %v599_v1 = vld [vmem:[%s748_s19 + $0x30] sm:$0xff]  ;;  %v598_v2 = vld [vmem:[%s748_s19 + $0x28] sm:$0xff] }
  0x10   : > { %632 = vmatpush.bf16.msra.mxu3 %v600_v0  ;;  %631 = vmatpush.bf16.msra.mxu2 %v600_v0  ;;  %v597_v3 = vld [vmem:[%s748_s19 + $0x20] sm:$0xff]  ;;  %v596_v4 = vld [vmem:[%s748_s19 + $0x18] sm:$0xff]  ;;  %v595_v5 = vld [vmem:[%s748_s19 + $0x10] sm:$0xff]  ;;  %s224_s26 = scalar_lea.vmem %s787_s0, %s654_s23  ;;  %s242_s4 = scalar_lea.vmem %s790_s3, %s654_s23 }
  0x11   : > { %352 = vmatpush.bf16.msra.mxu0 %v600_v0  ;;  %630 = vmatpush.bf16.msra.mxu1 %v600_v0  ;;  %v594_v6 = vld [vmem:[%s748_s19 + $0x8] sm:$0xff]  ;;  %v593_v7 = vld [vmem:[%s748_s19] sm:$0xff]  ;;  %v591_v8 = vld [vmem:[%s224_s26 + $0x18] sm:$0xff] }
  0x12   : > { %v590_v9 = vld [vmem:[%s224_s26 + $0x10] sm:$0xff]  ;;  %v588_v10 = vld [vmem:[%s224_s26] sm:$0xff]  ;;  %v589_v11 = vld [vmem:[%s224_s26 + $0x8] sm:$0xff] }
  0x13   : > { %v592_v12 = vld [vmem:[%s224_s26 + $0x20] sm:$0xff] }
  0x14   : > { %635 = vmatpush.bf16.msra.mxu3 %v599_v1  ;;  %634 = vmatpush.bf16.msra.mxu2 %v599_v1 }
  0x15   : > { %353 = vmatpush.bf16.msra.mxu0 %v599_v1  ;;  %633 = vmatpush.bf16.msra.mxu1 %v599_v1 }
  0x18   : > { %638 = vmatpush.bf16.msra.mxu3 %v598_v2  ;;  %637 = vmatpush.bf16.msra.mxu2 %v598_v2 }
  0x19   : > { %354 = vmatpush.bf16.msra.mxu0 %v598_v2  ;;  %636 = vmatpush.bf16.msra.mxu1 %v598_v2 }
  0x1c   : > { %641 = vmatpush.bf16.msra.mxu3 %v597_v3  ;;  %640 = vmatpush.bf16.msra.mxu2 %v597_v3 }
  0x1d   : > { %355 = vmatpush.bf16.msra.mxu0 %v597_v3  ;;  %639 = vmatpush.bf16.msra.mxu1 %v597_v3 }
  0x20   : > { %644 = vmatpush.bf16.msra.mxu3 %v596_v4  ;;  %643 = vmatpush.bf16.msra.mxu2 %v596_v4 }
  0x21   : > { %356 = vmatpush.bf16.msra.mxu0 %v596_v4  ;;  %642 = vmatpush.bf16.msra.mxu1 %v596_v4 }
  0x24   : > { %647 = vmatpush.bf16.msra.mxu3 %v595_v5  ;;  %646 = vmatpush.bf16.msra.mxu2 %v595_v5 }
  0x25   : > { %357 = vmatpush.bf16.msra.mxu0 %v595_v5  ;;  %645 = vmatpush.bf16.msra.mxu1 %v595_v5 }
  0x28   : > { %650 = vmatpush.bf16.msra.mxu3 %v594_v6  ;;  %649 = vmatpush.bf16.msra.mxu2 %v594_v6 }
  0x29   : > { %358 = vmatpush.bf16.msra.mxu0 %v594_v6  ;;  %648 = vmatpush.bf16.msra.mxu1 %v594_v6 }
  0x2c   : > { %653 = vmatpush.bf16.msra.mxu3 %v593_v7  ;;  %652 = vmatpush.bf16.msra.mxu2 %v593_v7 }
  0x2d   : > { %359 = vmatpush.bf16.msra.mxu0 %v593_v7  ;;  %651 = vmatpush.bf16.msra.mxu1 %v593_v7 }
  0x2f   : > { %375 = vmatmul.bf16.vlgmr.msra.gmra.mxu3 %v591_v8  ;;  %370 = vmatmul.bf16.vlgmr.msra.gmra.mxu2 %v590_v9 }
  0x30   : > { %360 = vmatmul.bf16.vlgmr.msra.gmra.mxu0 %v588_v10  ;;  %365 = vmatmul.bf16.vlgmr.msra.gmra.mxu1 %v589_v11 }
  0x3f   : > { %380 = vmatmul.bf16.gmra.mxu3 %v592_v12 }
  0xad   : > { %v361_v13 = vpop.f32.mrf.mxu0  ;;  %v366_v14 = vpop.f32.mrf.mxu1 }
  0xae   : > { %v362_v17 = vadd.f32 %v679_v15, %v361_v13  ;;  %v367_v18 = vadd.f32 %v679_v15, %v366_v14 }
  0xb0   : > { %v386_v22 = vmax.f32 %v362_v17, 0.0  ;;  %v388_v23 = vmax.f32 %v367_v18, 0.0 }
  0xb2   : > { %v376_v16 = vpop.f32.mrf.mxu3  ;;  %v371_v19 = vpop.f32.mrf.mxu2 }
  0xb3   : > { %v372_v26 = vadd.f32 %v679_v15, %v371_v19  ;;  %v377_v29 = vadd.f32 %v679_v15, %v376_v16 }
  0xb5   : > { %v363_v20 = vpop.f32.mrf.mxu0  ;;  %v368_v21 = vpop.f32.mrf.mxu1  ;;  %v390_v34 = vmax.f32 %v372_v26, 0.0  ;;  %v392_v37 = vmax.f32 %v377_v29, 0.0 }
  0xb6   : > { %v364_v24 = vadd.f32 %v679_v15, %v363_v20  ;;  %v369_v25 = vadd.f32 %v679_v15, %v368_v21 }
  0xb8   : > { %v387_v27 = vmax.f32 %v364_v24, 0.0  ;;  %v389_v28 = vmax.f32 %v369_v25, 0.0 }
  0xba   : > { %v378_v30 = vpop.f32.mrf.mxu3  ;;  %v604_v31 = vpack.c.bf16 %v387_v27, %v386_v22  ;;  %v609_v32 = vpack.c.bf16 %v389_v28, %v388_v23  ;;  %v373_v33 = vpop.f32.mrf.mxu2 }
  0xbb   : > { %v379_v35 = vadd.f32 %v679_v15, %v378_v30  ;;  %v374_v36 = vadd.f32 %v679_v15, %v373_v33 }
  0xbc   : > { %605 = vst [vmem:[%s242_s4] sm:$0xff] %v604_v31  }
  0xbd   : > { %v393_v38 = vmax.f32 %v379_v35, 0.0  ;;  %626 = vst [vmem:[%s242_s4 + $0x8] sm:$0xff] %v609_v32   ;;  %v391_v39 = vmax.f32 %v374_v36, 0.0 }
  0xbf   : > { %v619_v40 = vpack.c.bf16 %v393_v38, %v392_v37  ;;  %v614_v41 = vpack.c.bf16 %v391_v39, %v390_v34 }
  0xc1   : > { %628 = vst [vmem:[%s242_s4 + $0x18] sm:$0xff] %v619_v40  }
  0xc2   : > { %627 = vst [vmem:[%s242_s4 + $0x10] sm:$0xff] %v614_v41   ;;  %v381_v42 = vpop.f32.mrf.mxu3 }
  0xc3   : > { %v382_v43 = vadd.f32 %v679_v15, %v381_v42 }
  0xc5   : > { %v394_v46 = vmax.f32 %v382_v43, 0.0 }
  0xca   : > { %v383_v44 = vpop.f32.mrf.mxu3 }
  0xcb   : > { %v384_v45 = vadd.f32 %v679_v15, %v383_v44 }
  0xcd   : > { %v395_v47 = vmax.f32 %v384_v45, 0.0 }
  0xcf   : > { %v624_v48 = vpack.c.bf16 %v395_v47, %v394_v46 }
  0xd1   : > { %629 = vst [vmem:[%s242_s4 + $0x20] sm:$0xff] %v624_v48  }
  0xd2 PF: > { %s13_s14 = sadd.s32 1, %s702_s14   ;;  %s791_s12 = smov %s698_s13 }
  0xd3   : > { %p10_p5 = scmp.ge.s32.totalorder %s13_s14, 5   ;;  %s792_s13 = smov %s794_s15 }
  0xd5   :  { %12 = sbr.rel (!%p10_p5) target bundleno = 2 (0x2), region = 68 }

// kernel: decoder_recovery_forward.10
= control target key start
LH: loop header
LB: loop body
LE: loop exit
PB: predicated region body
PF: predicated region fallthrough
CT: control target
= control target key end

     0   :  { %s801_s12 = smov 0   ;;  %s803_s13 = smov 0   ;;  %s874_s0 = inlined_call_operand.vmem [shape: bf16[3,128,128], index: 0, kind: input, shape index: {}]   ;;  %s875_s1 = inlined_call_operand.vmem [shape: bf16[3,128,128], index: 1, kind: input, shape index: {}]   ;;  %s876_s2 = inlined_call_operand.vmem [shape: f32[3,1,128], index: 2, kind: input, shape index: {}]   ;;  %s877_s3 = inlined_call_operand.vmem [shape: bf16[3,128,128], index: 3, kind: output, shape index: {}]  }
   0x1   :  { %s805_s14 = smov 0  }
   0x2 LB: > { %s25_s15 = sadd.s32 1, %s775_s13  ;;  %p569_p0 = scmp.ge.s32.totalorder %s779_s14, 1  ;;  %s779_s14 = sphi %s805_s14, %s13_s14   ;;  %s775_s13 = sphi %s803_s13, %s879_s13   ;;  %s771_s12 = sphi %s801_s12, %s878_s12  }
   0x3   : > { %p27_p1 = scmp.ge.s32.totalorder %s25_s15, 3  ;;  %p176_p2 = scmp.lt.s32.totalorder %s779_s14, 4 }
   0x5   : > { %s881_s15 = smov (%p27_p1, %s25_s15), 0  ;;  %p177_p3 = pnand %p569_p0, %p176_p2 }
   0x6   : > { %p217_p4 = scmp.lt.s32.totalorder (!%p177_p3), %s771_s12, 2 }
   0x7   : > { %180 = sbr.rel (%p177_p3) target bundleno = 210 (0xd2), region = 32 }
   0xc   : > { %s883_s12 = smov (!%p217_p4, %s771_s12), 2 }
   0xd   : > { %s822_s16 = sshll.u32 %s883_s12, 6  ;;  %s233_s19 = scalar_lea.vmem %s876_s2, %s883_s12 }
   0xe   : > { %s832_s22 = scalar_lea.vmem %s875_s1, %s822_s16  ;;  %s224_s25 = scalar_lea.vmem %s874_s0, %s822_s16  ;;  %v756_v18 = vld [vmem:[%s233_s19] ss:$0 sm:$0xff] }
   0xf   : > { %v660_v0 = vld [vmem:[%s832_s22 + $0x38] sm:$0xff]  ;;  %v659_v1 = vld [vmem:[%s832_s22 + $0x30] sm:$0xff]  ;;  %v658_v2 = vld [vmem:[%s832_s22 + $0x28] sm:$0xff]  ;;  %s855_s30 = scalar_lea.vmem %s877_s3, %s822_s16 }
  0x10   : > { %376 = vmatpush.bf16.msra.mxu0 %v660_v0  ;;  %708 = vmatpush.bf16.msra.mxu1 %v660_v0  ;;  %v657_v3 = vld [vmem:[%s832_s22 + $0x20] sm:$0xff]  ;;  %v656_v4 = vld [vmem:[%s832_s22 + $0x18] sm:$0xff]  ;;  %v655_v5 = vld [vmem:[%s832_s22 + $0x10] sm:$0xff] }
  0x11   : > { %709 = vmatpush.bf16.msra.mxu2 %v660_v0  ;;  %710 = vmatpush.bf16.msra.mxu3 %v660_v0  ;;  %v654_v6 = vld [vmem:[%s832_s22 + $0x8] sm:$0xff]  ;;  %v653_v7 = vld [vmem:[%s832_s22] sm:$0xff]  ;;  %v647_v9 = vld [vmem:[%s224_s25 + $0x10] sm:$0xff] }
  0x12   : > { %v645_v8 = vld [vmem:[%s224_s25] sm:$0xff]  ;;  %v651_v11 = vld [vmem:[%s224_s25 + $0x30] sm:$0xff]  ;;  %v646_v12 = vld [vmem:[%s224_s25 + $0x8] sm:$0xff] }
  0x13   : > { %v649_v10 = vld [vmem:[%s224_s25 + $0x20] sm:$0xff]  ;;  %v648_v13 = vld [vmem:[%s224_s25 + $0x18] sm:$0xff]  ;;  %v650_v14 = vld [vmem:[%s224_s25 + $0x28] sm:$0xff] }
  0x14   : > { %377 = vmatpush.bf16.msra.mxu0 %v659_v1  ;;  %711 = vmatpush.bf16.msra.mxu1 %v659_v1  ;;  %v652_v15 = vld [vmem:[%s224_s25 + $0x38] sm:$0xff] }
  0x15   : > { %712 = vmatpush.bf16.msra.mxu2 %v659_v1  ;;  %713 = vmatpush.bf16.msra.mxu3 %v659_v1 }
  0x18   : > { %378 = vmatpush.bf16.msra.mxu0 %v658_v2  ;;  %714 = vmatpush.bf16.msra.mxu1 %v658_v2 }
  0x19   : > { %715 = vmatpush.bf16.msra.mxu2 %v658_v2  ;;  %716 = vmatpush.bf16.msra.mxu3 %v658_v2 }
  0x1c   : > { %379 = vmatpush.bf16.msra.mxu0 %v657_v3  ;;  %717 = vmatpush.bf16.msra.mxu1 %v657_v3 }
  0x1d   : > { %718 = vmatpush.bf16.msra.mxu2 %v657_v3  ;;  %719 = vmatpush.bf16.msra.mxu3 %v657_v3 }
  0x20   : > { %380 = vmatpush.bf16.msra.mxu0 %v656_v4  ;;  %720 = vmatpush.bf16.msra.mxu1 %v656_v4 }
  0x21   : > { %721 = vmatpush.bf16.msra.mxu2 %v656_v4  ;;  %722 = vmatpush.bf16.msra.mxu3 %v656_v4 }
  0x24   : > { %381 = vmatpush.bf16.msra.mxu0 %v655_v5  ;;  %723 = vmatpush.bf16.msra.mxu1 %v655_v5 }
  0x25   : > { %724 = vmatpush.bf16.msra.mxu2 %v655_v5  ;;  %725 = vmatpush.bf16.msra.mxu3 %v655_v5 }
  0x28   : > { %382 = vmatpush.bf16.msra.mxu0 %v654_v6  ;;  %726 = vmatpush.bf16.msra.mxu1 %v654_v6 }
  0x29   : > { %727 = vmatpush.bf16.msra.mxu2 %v654_v6  ;;  %728 = vmatpush.bf16.msra.mxu3 %v654_v6 }
  0x2c   : > { %383 = vmatpush.bf16.msra.mxu0 %v653_v7  ;;  %729 = vmatpush.bf16.msra.mxu1 %v653_v7 }
  0x2d   : > { %730 = vmatpush.bf16.msra.mxu2 %v653_v7  ;;  %731 = vmatpush.bf16.msra.mxu3 %v653_v7 }
  0x2f   : > { %384 = vmatmul.bf16.vlgmr.msra.gmra.mxu0 %v645_v8  ;;  %394 = vmatmul.bf16.vlgmr.msra.gmra.mxu1 %v647_v9 }
  0x30   : > { %404 = vmatmul.bf16.vlgmr.msra.gmra.mxu2 %v649_v10  ;;  %414 = vmatmul.bf16.vlgmr.msra.gmra.mxu3 %v651_v11 }
  0x3f   : > { %389 = vmatmul.bf16.gmra.mxu0 %v646_v12  ;;  %399 = vmatmul.bf16.gmra.mxu1 %v648_v13 }
  0x40   : > { %409 = vmatmul.bf16.gmra.mxu2 %v650_v14  ;;  %419 = vmatmul.bf16.gmra.mxu3 %v652_v15 }
  0xac   : > { %v385_v16 = vpop.f32.mrf.mxu0  ;;  %v395_v17 = vpop.f32.mrf.mxu1 }
  0xad   : > { %v386_v23 = vadd.f32 %v756_v18, %v385_v16  ;;  %v396_v24 = vadd.f32 %v756_v18, %v395_v17 }
  0xb3   : > { %v405_v19 = vpop.f32.mrf.mxu2  ;;  %v415_v20 = vpop.f32.mrf.mxu3 }
  0xb4   : > { %v387_v21 = vpop.f32.mrf.mxu0  ;;  %v397_v22 = vpop.f32.mrf.mxu1  ;;  %v406_v31 = vadd.f32 %v756_v18, %v405_v19  ;;  %v416_v32 = vadd.f32 %v756_v18, %v415_v20 }
  0xb5   : > { %v388_v25 = vadd.f32 %v756_v18, %v387_v21  ;;  %v398_v26 = vadd.f32 %v756_v18, %v397_v22 }
  0xb7   : > { %v664_v27 = vpack.c.bf16 %v388_v25, %v386_v23  ;;  %v674_v28 = vpack.c.bf16 %v398_v26, %v396_v24 }
  0xb9   : > { %665 = vst [vmem:[%s855_s30] sm:$0xff] %v664_v27  }
  0xba   : > { %702 = vst [vmem:[%s855_s30 + $0x10] sm:$0xff] %v674_v28  }
  0xbb   : > { %v407_v29 = vpop.f32.mrf.mxu2  ;;  %v417_v30 = vpop.f32.mrf.mxu3 }
  0xbc   : > { %v408_v33 = vadd.f32 %v756_v18, %v407_v29  ;;  %v418_v34 = vadd.f32 %v756_v18, %v417_v30  ;;  %v390_v35 = vpop.f32.mrf.mxu0  ;;  %v400_v36 = vpop.f32.mrf.mxu1 }
  0xbd   : > { %v391_v43 = vadd.f32 %v756_v18, %v390_v35  ;;  %v401_v44 = vadd.f32 %v756_v18, %v400_v36 }
  0xbe   : > { %v684_v37 = vpack.c.bf16 %v408_v33, %v406_v31  ;;  %v694_v38 = vpack.c.bf16 %v418_v34, %v416_v32 }
  0xc0   : > { %704 = vst [vmem:[%s855_s30 + $0x20] sm:$0xff] %v684_v37  }
  0xc1   : > { %706 = vst [vmem:[%s855_s30 + $0x30] sm:$0xff] %v694_v38  }
  0xc3   : > { %v410_v39 = vpop.f32.mrf.mxu2  ;;  %v420_v40 = vpop.f32.mrf.mxu3 }
  0xc4   : > { %v392_v41 = vpop.f32.mrf.mxu0  ;;  %v402_v42 = vpop.f32.mrf.mxu1  ;;  %v411_v51 = vadd.f32 %v756_v18, %v410_v39  ;;  %v421_v52 = vadd.f32 %v756_v18, %v420_v40 }
  0xc5   : > { %v393_v45 = vadd.f32 %v756_v18, %v392_v41  ;;  %v403_v46 = vadd.f32 %v756_v18, %v402_v42 }
  0xc7   : > { %v669_v47 = vpack.c.bf16 %v393_v45, %v391_v43  ;;  %v679_v48 = vpack.c.bf16 %v403_v46, %v401_v44 }
  0xc9   : > { %701 = vst [vmem:[%s855_s30 + $0x8] sm:$0xff] %v669_v47  }
  0xca   : > { %703 = vst [vmem:[%s855_s30 + $0x18] sm:$0xff] %v679_v48  }
  0xcb   : > { %v412_v49 = vpop.f32.mrf.mxu2  ;;  %v422_v50 = vpop.f32.mrf.mxu3 }
  0xcc   : > { %v413_v53 = vadd.f32 %v756_v18, %v412_v49  ;;  %v423_v54 = vadd.f32 %v756_v18, %v422_v50 }
  0xce   : > { %v689_v55 = vpack.c.bf16 %v413_v53, %v411_v51  ;;  %v699_v56 = vpack.c.bf16 %v423_v54, %v421_v52 }
  0xd0   : > { %705 = vst [vmem:[%s855_s30 + $0x28] sm:$0xff] %v689_v55  }
  0xd1   : > { %707 = vst [vmem:[%s855_s30 + $0x38] sm:$0xff] %v699_v56  }
  0xd2 PF: > { %s13_s14 = sadd.s32 1, %s779_s14   ;;  %s878_s12 = smov %s775_s13 }
  0xd3   : > { %p10_p5 = scmp.ge.s32.totalorder %s13_s14, 5   ;;  %s879_s13 = smov %s881_s15 }
  0xd5   :  { %12 = sbr.rel (!%p10_p5) target bundleno = 2 (0x2), region = 68 }

// kernel: tile.108
= control target key start
LH: loop header
LB: loop body
LE: loop exit
PB: predicated region body
PF: predicated region fallthrough
CT: control target
= control target key end

     0   :  { %s22_s0 = inlined_call_operand.vmem [shape: f32[16], index: 0, kind: input, shape index: {}]   ;;  %s23_s1 = inlined_call_operand.vmem [shape: f32[4,16], index: 1, kind: output, shape index: {}]  }
   0x1   :  { %v4_v0 = vld [vmem:[%s22_s0] ss:$0 sm:$0xff] }
   0x2   :  { %5 = vst [vmem:[%s23_s1] sm:$0xf] %v4_v0 }

// kernel: tile.109
= control target key start
LH: loop header
LB: loop body
LE: loop exit
PB: predicated region body
PF: predicated region fallthrough
CT: control target
= control target key end

     0   :  { %s37_s8 = smov 16   ;;  %s38_s9 = smov 32   ;;  %vm7_vm0 = vcmask 130048   ;;  %vm13_vm1 = vcmask 523648   ;;  %vm19_vm2 = vcmask 392448   ;;  %vm25_vm3 = vcmask 261248   ;;  %s55_s0 = inlined_call_operand.vmem [shape: f32[4,16], index: 0, kind: input, shape index: {}]   ;;  %s56_s1 = inlined_call_operand.vmem [shape: f32[1,1,64], index: 1, kind: output, shape index: {}]  }
   0x1   :  { %v4_v0 = vld [vmem:[%s55_s0] sm:$0xf]  ;;  %s36_s0 = smov 48  }
   0x2   :  { %5 = vst [vmem:[#allocation1] sm:$0xf] %v4_v0 }
   0x9   :  { %v10_v1 = vld [vmem:[#allocation1 + $0x3] sm:$0x1]   ;;  %v22_v2 = vld [vmem:[#allocation1 + $0x1] sm:$0x1]   ;;  %v16_v3 = vld [vmem:[#allocation1 + $0x2] sm:$0x1]  }
   0xa   :  { %11 = vrot.lane.b32.xlu0 %v10_v1, %s36_s0  ;;  %23 = vrot.lane.b32.xlu1 %v22_v2, %s37_s8  ;;  %v6_v4 = vld [vmem:[#allocation1] sm:$0x1]  }
   0xb   :  { %8 = vst.msk [vmem:[#allocation0] sm:$0x1] %vm7_vm0, %v6_v4  }
  0x12   :  { %17 = vrot.lane.b32.xlu0 %v16_v3, %s38_s9 }
  0x7c   :  { %v12_v5 = vpop.permute.xlu0 %11   ;;  %v24_v6 = vpop.permute.xlu1 %23  }
  0x7d   :  { %14 = vst.msk [vmem:[#allocation0] sm:$0x1] %vm13_vm1, %v12_v5  }
  0x84   :  { %v18_v7 = vpop.permute.xlu0 %17  }
  0x85   :  { %20 = vst.msk [vmem:[#allocation0] sm:$0x1] %vm19_vm2, %v18_v7  }
  0x86   :  { %26 = vst.msk [vmem:[#allocation0] sm:$0x1] %vm25_vm3, %v24_v6  }
  0x8d   :  { %v29_v8 = vld [vmem:[#allocation0] sm:$0x1] }
  0x8e   :  { %32 = vst [vmem:[%s56_s1] sm:$0x1] %v29_v8 }

// kernel: decoder_recovery_forward.11
= control target key start
LH: loop header
LB: loop body
LE: loop exit
PB: predicated region body
PF: predicated region fallthrough
CT: control target
= control target key end

     0   :  { %vm86_vm0 = vcmask 523264   ;;  %vm156_vm1 = vcmask 519168   ;;  %s324_s1 = inlined_call_operand.vmem [shape: bf16[1,64,64], index: 1, kind: input, shape index: {}]   ;;  %s325_s2 = inlined_call_operand.vmem [shape: f32[1,1,64], index: 2, kind: input, shape index: {}]   ;;  %s326_s0 = inlined_call_operand.vmem [shape: bf16[1,80,64], index: 0, kind: input, shape index: {}]   ;;  %s327_s3 = inlined_call_operand.vmem [shape: bf16[1,80,64], index: 3, kind: output, shape index: {}]  }
   0x1   :  { %v220_v0 = vld [vmem:[%s324_s1 + $0x18] sm:$0xff]  ;;  %v219_v1 = vld [vmem:[%s324_s1 + $0x10] sm:$0xff]  ;;  %v218_v2 = vld [vmem:[%s324_s1 + $0x8] sm:$0xff] }
   0x2   :  { %223 = vmatpush.bf16.msra.mxu3 %v220_v0  ;;  %222 = vmatpush.bf16.msra.mxu2 %v220_v0  ;;  %v217_v3 = vld [vmem:[%s324_s1] sm:$0xff]  ;;  %v215_v4 = vld [vmem:[%s326_s0 + $0x18] sm:$0xff]  ;;  %v214_v5 = vld [vmem:[%s326_s0 + $0x10] sm:$0xff] }
   0x3   :  { %106 = vmatpush.bf16.msra.mxu0 %v220_v0  ;;  %221 = vmatpush.bf16.msra.mxu1 %v220_v0  ;;  %v212_v6 = vld [vmem:[%s326_s0] sm:$0xff]  ;;  %v213_v7 = vld [vmem:[%s326_s0 + $0x8] sm:$0xff] }
   0x4   :  { %v216_v8 = vld [vmem:[%s326_s0 + $0x20] sm:$0xff] }
   0x5   :  { %v233_v9 = vld [vmem:[%s325_s2] ss:$0 sm:$0xff] }
   0x6   :  { %226 = vmatpush.bf16.msra.mxu3 %v219_v1  ;;  %225 = vmatpush.bf16.msra.mxu2 %v219_v1 }
   0x7   :  { %107 = vmatpush.bf16.msra.mxu0 %v219_v1  ;;  %224 = vmatpush.bf16.msra.mxu1 %v219_v1 }
   0xa   :  { %229 = vmatpush.bf16.msra.mxu3 %v218_v2  ;;  %228 = vmatpush.bf16.msra.mxu2 %v218_v2 }
   0xb   :  { %108 = vmatpush.bf16.msra.mxu0 %v218_v2  ;;  %227 = vmatpush.bf16.msra.mxu1 %v218_v2 }
   0xe   :  { %232 = vmatpush.bf16.msra.mxu3 %v217_v3  ;;  %231 = vmatpush.bf16.msra.mxu2 %v217_v3 }
   0xf   :  { %109 = vmatpush.bf16.msra.mxu0 %v217_v3  ;;  %230 = vmatpush.bf16.msra.mxu1 %v217_v3 }
  0x11   :  { %210 = vmatmul.msk.bf16.vlgmr.msra.gmra.mxu3 %vm86_vm0, %v215_v4  ;;  %209 = vmatmul.msk.bf16.vlgmr.msra.gmra.mxu2 %vm86_vm0, %v214_v5 }
  0x12   :  { %207 = vmatmul.msk.bf16.vlgmr.msra.gmra.mxu0 %vm86_vm0, %v212_v6  ;;  %208 = vmatmul.msk.bf16.vlgmr.msra.gmra.mxu1 %vm86_vm0, %v213_v7 }
  0x21   :  { %211 = vmatmul.msk.bf16.gmra.mxu3 %vm86_vm0, %v216_v8 }
  0x8f   :  { %v111_v10 = vpop.f32.mrf.mxu0  ;;  %v116_v11 = vpop.f32.mrf.mxu1 }
  0x90   :  { %v112_v12 = vadd.f32 %v233_v9, %v111_v10  ;;  %v117_v13 = vadd.f32 %v233_v9, %v116_v11 }
  0x92   :  { %v136_v14 = vmax.f32 %v112_v12, 0.0  ;;  %v138_v15 = vmax.f32 %v117_v13, 0.0 }
  0x94   :  { %v126_v16 = vpop.f32.mrf.mxu3  ;;  %v146_v17 = vpack.c.bf16 %v136_v14, %v136_v14  ;;  %v148_v18 = vpack.c.bf16 %v138_v15, %v138_v15  ;;  %v121_v19 = vpop.f32.mrf.mxu2 }
  0x95   :  { %v127_v20 = vadd.f32 %v233_v9, %v126_v16  ;;  %v122_v21 = vadd.f32 %v233_v9, %v121_v19 }
  0x96   :  { %157 = vst.msk [vmem:[%s327_s3] sm:$0xf] %vm156_vm1, %v146_v17 }
  0x97   :  { %v142_v22 = vmax.f32 %v127_v20, 0.0  ;;  %159 = vst.msk [vmem:[%s327_s3 + $0x8] sm:$0xf] %vm156_vm1, %v148_v18  ;;  %v140_v23 = vmax.f32 %v122_v21, 0.0  ;;  %v113_v24 = vpop.f32.mrf.mxu0  ;;  %v118_v25 = vpop.f32.mrf.mxu1 }
  0x98   :  { %v114_v26 = vadd.f32 %v233_v9, %v113_v24  ;;  %v119_v27 = vadd.f32 %v233_v9, %v118_v25 }
  0x99   :  { %v152_v28 = vpack.c.bf16 %v142_v22, %v142_v22  ;;  %v150_v29 = vpack.c.bf16 %v140_v23, %v140_v23 }
  0x9a   :  { %v137_v30 = vmax.f32 %v114_v26, 0.0  ;;  %v139_v31 = vmax.f32 %v119_v27, 0.0 }
  0x9b   :  { %163 = vst.msk [vmem:[%s327_s3 + $0x18] sm:$0xf] %vm156_vm1, %v152_v28 }
  0x9c   :  { %161 = vst.msk [vmem:[%s327_s3 + $0x10] sm:$0xf] %vm156_vm1, %v150_v29  ;;  %v128_v32 = vpop.f32.mrf.mxu3  ;;  %v147_v33 = vpack.c.bf16 %v137_v30, %v137_v30  ;;  %v149_v34 = vpack.c.bf16 %v139_v31, %v139_v31  ;;  %v123_v35 = vpop.f32.mrf.mxu2 }
  0x9d   :  { %v129_v36 = vadd.f32 %v233_v9, %v128_v32  ;;  %v124_v37 = vadd.f32 %v233_v9, %v123_v35 }
  0x9e   :  { %158 = vst.msk [vmem:[%s327_s3 + $0x4] sm:$0xf] %vm156_vm1, %v147_v33 }
  0x9f   :  { %v143_v38 = vmax.f32 %v129_v36, 0.0  ;;  %160 = vst.msk [vmem:[%s327_s3 + $0xc] sm:$0xf] %vm156_vm1, %v149_v34  ;;  %v141_v39 = vmax.f32 %v124_v37, 0.0 }
  0xa1   :  { %v153_v40 = vpack.c.bf16 %v143_v38, %v143_v38  ;;  %v151_v41 = vpack.c.bf16 %v141_v39, %v141_v39 }
  0xa3   :  { %164 = vst.msk [vmem:[%s327_s3 + $0x1c] sm:$0xf] %vm156_vm1, %v153_v40 }
  0xa4   :  { %162 = vst.msk [vmem:[%s327_s3 + $0x14] sm:$0xf] %vm156_vm1, %v151_v41  ;;  %v131_v42 = vpop.f32.mrf.mxu3 }
  0xa5   :  { %v132_v43 = vadd.f32 %v233_v9, %v131_v42 }
  0xa7   :  { %v144_v44 = vmax.f32 %v132_v43, 0.0 }
  0xa9   :  { %v154_v45 = vpack.c.bf16 %v144_v44, %v144_v44 }
  0xab   :  { %165 = vst.msk [vmem:[%s327_s3 + $0x20] sm:$0xf] %vm156_vm1, %v154_v45 }
  0xac   :  { %v133_v46 = vpop.f32.mrf.mxu3 }
  0xad   :  { %v134_v47 = vadd.f32 %v233_v9, %v133_v46 }
  0xaf   :  { %v145_v48 = vmax.f32 %v134_v47, 0.0 }
  0xb1   :  { %v155_v49 = vpack.c.bf16 %v145_v48, %v145_v48 }
  0xb3   :  { %166 = vst.msk [vmem:[%s327_s3 + $0x24] sm:$0xf] %vm156_vm1, %v155_v49 }

// kernel: decoder_recovery_forward.12
= control target key start
LH: loop header
LB: loop body
LE: loop exit
PB: predicated region body
PF: predicated region fallthrough
CT: control target
= control target key end

     0   :  { %vm107_vm0 = vcmask 523264   ;;  %vm197_vm1 = vcmask 519168   ;;  %s430_s1 = inlined_call_operand.vmem [shape: bf16[1,64,64], index: 1, kind: input, shape index: {}]   ;;  %s431_s2 = inlined_call_operand.vmem [shape: f32[1,1,64], index: 2, kind: input, shape index: {}]   ;;  %s432_s0 = inlined_call_operand.vmem [shape: bf16[1,128,64], index: 0, kind: input, shape index: {}]   ;;  %s433_s3 = inlined_call_operand.vmem [shape: bf16[1,128,64], index: 3, kind: output, shape index: {}]  }
   0x1   :  { %v285_v0 = vld [vmem:[%s430_s1 + $0x18] sm:$0xff]  ;;  %v284_v1 = vld [vmem:[%s430_s1 + $0x10] sm:$0xff]  ;;  %v283_v2 = vld [vmem:[%s430_s1 + $0x8] sm:$0xff] }
   0x2   :  { %136 = vmatpush.bf16.msra.mxu0 %v285_v0  ;;  %286 = vmatpush.bf16.msra.mxu1 %v285_v0  ;;  %v282_v3 = vld [vmem:[%s430_s1] sm:$0xff]  ;;  %v276_v5 = vld [vmem:[%s432_s0 + $0x10] sm:$0xff]  ;;  %v275_v8 = vld [vmem:[%s432_s0 + $0x8] sm:$0xff] }
   0x3   :  { %287 = vmatpush.bf16.msra.mxu2 %v285_v0  ;;  %288 = vmatpush.bf16.msra.mxu3 %v285_v0  ;;  %v274_v4 = vld [vmem:[%s432_s0] sm:$0xff]  ;;  %v280_v7 = vld [vmem:[%s432_s0 + $0x30] sm:$0xff]  ;;  %v277_v9 = vld [vmem:[%s432_s0 + $0x18] sm:$0xff] }
   0x4   :  { %v278_v6 = vld [vmem:[%s432_s0 + $0x20] sm:$0xff]  ;;  %v279_v10 = vld [vmem:[%s432_s0 + $0x28] sm:$0xff]  ;;  %v281_v11 = vld [vmem:[%s432_s0 + $0x38] sm:$0xff] }
   0x5   :  { %v298_v12 = vld [vmem:[%s431_s2] ss:$0 sm:$0xff] }
   0x6   :  { %137 = vmatpush.bf16.msra.mxu0 %v284_v1  ;;  %289 = vmatpush.bf16.msra.mxu1 %v284_v1 }
   0x7   :  { %290 = vmatpush.bf16.msra.mxu2 %v284_v1  ;;  %291 = vmatpush.bf16.msra.mxu3 %v284_v1 }
   0xa   :  { %138 = vmatpush.bf16.msra.mxu0 %v283_v2  ;;  %292 = vmatpush.bf16.msra.mxu1 %v283_v2 }
   0xb   :  { %293 = vmatpush.bf16.msra.mxu2 %v283_v2  ;;  %294 = vmatpush.bf16.msra.mxu3 %v283_v2 }
   0xe   :  { %139 = vmatpush.bf16.msra.mxu0 %v282_v3  ;;  %295 = vmatpush.bf16.msra.mxu1 %v282_v3 }
   0xf   :  { %296 = vmatpush.bf16.msra.mxu2 %v282_v3  ;;  %297 = vmatpush.bf16.msra.mxu3 %v282_v3 }
  0x11   :  { %266 = vmatmul.msk.bf16.vlgmr.msra.gmra.mxu0 %vm107_vm0, %v274_v4  ;;  %268 = vmatmul.msk.bf16.vlgmr.msra.gmra.mxu1 %vm107_vm0, %v276_v5 }
  0x12   :  { %270 = vmatmul.msk.bf16.vlgmr.msra.gmra.mxu2 %vm107_vm0, %v278_v6  ;;  %272 = vmatmul.msk.bf16.vlgmr.msra.gmra.mxu3 %vm107_vm0, %v280_v7 }
  0x21   :  { %267 = vmatmul.msk.bf16.gmra.mxu0 %vm107_vm0, %v275_v8  ;;  %269 = vmatmul.msk.bf16.gmra.mxu1 %vm107_vm0, %v277_v9 }
  0x22   :  { %271 = vmatmul.msk.bf16.gmra.mxu2 %vm107_vm0, %v279_v10  ;;  %273 = vmatmul.msk.bf16.gmra.mxu3 %vm107_vm0, %v281_v11 }
  0x8e   :  { %v141_v13 = vpop.f32.mrf.mxu0  ;;  %v151_v14 = vpop.f32.mrf.mxu1 }
  0x8f   :  { %v142_v15 = vadd.f32 %v298_v12, %v141_v13  ;;  %v152_v16 = vadd.f32 %v298_v12, %v151_v14 }
  0x91   :  { %v181_v17 = vpack.c.bf16 %v142_v15, %v142_v15  ;;  %v185_v18 = vpack.c.bf16 %v152_v16, %v152_v16 }
  0x93   :  { %198 = vst.msk [vmem:[%s433_s3] sm:$0xf] %vm197_vm1, %v181_v17 }
  0x94   :  { %202 = vst.msk [vmem:[%s433_s3 + $0x10] sm:$0xf] %vm197_vm1, %v185_v18 }
  0x95   :  { %v161_v19 = vpop.f32.mrf.mxu2  ;;  %v171_v20 = vpop.f32.mrf.mxu3 }
  0x96   :  { %v162_v21 = vadd.f32 %v298_v12, %v161_v19  ;;  %v172_v22 = vadd.f32 %v298_v12, %v171_v20  ;;  %v143_v23 = vpop.f32.mrf.mxu0  ;;  %v153_v24 = vpop.f32.mrf.mxu1 }
  0x97   :  { %v144_v25 = vadd.f32 %v298_v12, %v143_v23  ;;  %v154_v26 = vadd.f32 %v298_v12, %v153_v24 }
  0x98   :  { %v189_v27 = vpack.c.bf16 %v162_v21, %v162_v21  ;;  %v193_v28 = vpack.c.bf16 %v172_v22, %v172_v22 }
  0x99   :  { %v182_v29 = vpack.c.bf16 %v144_v25, %v144_v25  ;;  %v186_v30 = vpack.c.bf16 %v154_v26, %v154_v26 }
  0x9a   :  { %206 = vst.msk [vmem:[%s433_s3 + $0x20] sm:$0xf] %vm197_vm1, %v189_v27 }
  0x9b   :  { %210 = vst.msk [vmem:[%s433_s3 + $0x30] sm:$0xf] %vm197_vm1, %v193_v28 }
  0x9c   :  { %199 = vst.msk [vmem:[%s433_s3 + $0x4] sm:$0xf] %vm197_vm1, %v182_v29 }
  0x9d   :  { %203 = vst.msk [vmem:[%s433_s3 + $0x14] sm:$0xf] %vm197_vm1, %v186_v30  ;;  %v163_v31 = vpop.f32.mrf.mxu2  ;;  %v173_v32 = vpop.f32.mrf.mxu3 }
  0x9e   :  { %v164_v33 = vadd.f32 %v298_v12, %v163_v31  ;;  %v174_v34 = vadd.f32 %v298_v12, %v173_v32  ;;  %v146_v35 = vpop.f32.mrf.mxu0  ;;  %v156_v36 = vpop.f32.mrf.mxu1 }
  0x9f   :  { %v147_v37 = vadd.f32 %v298_v12, %v146_v35  ;;  %v157_v38 = vadd.f32 %v298_v12, %v156_v36 }
  0xa0   :  { %v190_v39 = vpack.c.bf16 %v164_v33, %v164_v33  ;;  %v194_v40 = vpack.c.bf16 %v174_v34, %v174_v34 }
  0xa1   :  { %v183_v41 = vpack.c.bf16 %v147_v37, %v147_v37  ;;  %v187_v42 = vpack.c.bf16 %v157_v38, %v157_v38 }
  0xa2   :  { %207 = vst.msk [vmem:[%s433_s3 + $0x24] sm:$0xf] %vm197_vm1, %v190_v39 }
  0xa3   :  { %211 = vst.msk [vmem:[%s433_s3 + $0x34] sm:$0xf] %vm197_vm1, %v194_v40 }
  0xa4   :  { %200 = vst.msk [vmem:[%s433_s3 + $0x8] sm:$0xf] %vm197_vm1, %v183_v41 }
  0xa5   :  { %204 = vst.msk [vmem:[%s433_s3 + $0x18] sm:$0xf] %vm197_vm1, %v187_v42  ;;  %v166_v43 = vpop.f32.mrf.mxu2  ;;  %v176_v44 = vpop.f32.mrf.mxu3 }
  0xa6   :  { %v167_v45 = vadd.f32 %v298_v12, %v166_v43  ;;  %v177_v46 = vadd.f32 %v298_v12, %v176_v44  ;;  %v148_v47 = vpop.f32.mrf.mxu0  ;;  %v158_v48 = vpop.f32.mrf.mxu1 }
  0xa7   :  { %v149_v49 = vadd.f32 %v298_v12, %v148_v47  ;;  %v159_v50 = vadd.f32 %v298_v12, %v158_v48 }
  0xa8   :  { %v191_v51 = vpack.c.bf16 %v167_v45, %v167_v45  ;;  %v195_v52 = vpack.c.bf16 %v177_v46, %v177_v46 }
  0xa9   :  { %v184_v53 = vpack.c.bf16 %v149_v49, %v149_v49  ;;  %v188_v54 = vpack.c.bf16 %v159_v50, %v159_v50 }
  0xaa   :  { %208 = vst.msk [vmem:[%s433_s3 + $0x28] sm:$0xf] %vm197_vm1, %v191_v51 }
  0xab   :  { %212 = vst.msk [vmem:[%s433_s3 + $0x38] sm:$0xf] %vm197_vm1, %v195_v52 }
  0xac   :  { %201 = vst.msk [vmem:[%s433_s3 + $0xc] sm:$0xf] %vm197_vm1, %v184_v53 }
  0xad   :  { %205 = vst.msk [vmem:[%s433_s3 + $0x1c] sm:$0xf] %vm197_vm1, %v188_v54  ;;  %v168_v55 = vpop.f32.mrf.mxu2  ;;  %v178_v56 = vpop.f32.mrf.mxu3 }
  0xae   :  { %v169_v57 = vadd.f32 %v298_v12, %v168_v55  ;;  %v179_v58 = vadd.f32 %v298_v12, %v178_v56 }
  0xb0   :  { %v192_v59 = vpack.c.bf16 %v169_v57, %v169_v57  ;;  %v196_v60 = vpack.c.bf16 %v179_v58, %v179_v58 }
  0xb2   :  { %209 = vst.msk [vmem:[%s433_s3 + $0x2c] sm:$0xf] %vm197_vm1, %v192_v59 }
  0xb3   :  { %213 = vst.msk [vmem:[%s433_s3 + $0x3c] sm:$0xf] %vm197_vm1, %v196_v60 }

// kernel: tile.118
= control target key start
LH: loop header
LB: loop body
LE: loop exit
PB: predicated region body
PF: predicated region fallthrough
CT: control target
= control target key end

     0   :  { %s22_s0 = inlined_call_operand.vmem [shape: f32[8], index: 0, kind: input, shape index: {}]   ;;  %s23_s1 = inlined_call_operand.vmem [shape: f32[4,8], index: 1, kind: output, shape index: {}]  }
   0x1   :  { %v4_v0 = vld [vmem:[%s22_s0] ss:$0 sm:$0xff] }
   0x2   :  { %5 = vst [vmem:[%s23_s1] sm:$0xf] %v4_v0 }

// kernel: tile.119
= control target key start
LH: loop header
LB: loop body
LE: loop exit
PB: predicated region body
PF: predicated region fallthrough
CT: control target
= control target key end

     0   :  { %s37_s8 = smov 8   ;;  %s38_s9 = smov 16   ;;  %vm7_vm0 = vcmask 64512   ;;  %vm13_vm1 = vcmask 261312   ;;  %vm19_vm2 = vcmask 195712   ;;  %vm25_vm3 = vcmask 130112   ;;  %s55_s0 = inlined_call_operand.vmem [shape: f32[4,8], index: 0, kind: input, shape index: {}]   ;;  %s56_s1 = inlined_call_operand.vmem [shape: f32[1,1,32], index: 1, kind: output, shape index: {}]  }
   0x1   :  { %v4_v0 = vld [vmem:[%s55_s0] sm:$0xf]  ;;  %s36_s0 = smov 24  }
   0x2   :  { %5 = vst [vmem:[#allocation1] sm:$0xf] %v4_v0 }
   0x9   :  { %v10_v1 = vld [vmem:[#allocation1 + $0x3] sm:$0x1]   ;;  %v22_v2 = vld [vmem:[#allocation1 + $0x1] sm:$0x1]   ;;  %v16_v3 = vld [vmem:[#allocation1 + $0x2] sm:$0x1]  }
   0xa   :  { %11 = vrot.lane.b32.xlu0 %v10_v1, %s36_s0  ;;  %23 = vrot.lane.b32.xlu1 %v22_v2, %s37_s8  ;;  %v6_v4 = vld [vmem:[#allocation1] sm:$0x1]  }
   0xb   :  { %8 = vst.msk [vmem:[#allocation0] sm:$0x1] %vm7_vm0, %v6_v4  }
  0x12   :  { %17 = vrot.lane.b32.xlu0 %v16_v3, %s38_s9 }
  0x7c   :  { %v12_v5 = vpop.permute.xlu0 %11   ;;  %v24_v6 = vpop.permute.xlu1 %23  }
  0x7d   :  { %14 = vst.msk [vmem:[#allocation0] sm:$0x1] %vm13_vm1, %v12_v5  }
  0x84   :  { %v18_v7 = vpop.permute.xlu0 %17  }
  0x85   :  { %20 = vst.msk [vmem:[#allocation0] sm:$0x1] %vm19_vm2, %v18_v7  }
  0x86   :  { %26 = vst.msk [vmem:[#allocation0] sm:$0x1] %vm25_vm3, %v24_v6  }
  0x8d   :  { %v29_v8 = vld [vmem:[#allocation0] sm:$0x1] }
  0x8e   :  { %32 = vst [vmem:[%s56_s1] sm:$0x1] %v29_v8 }

// kernel: decoder_recovery_forward.13
= control target key start
LH: loop header
LB: loop body
LE: loop exit
PB: predicated region body
PF: predicated region fallthrough
CT: control target
= control target key end

     0   :  { %vm91_vm0 = vcmask 261120   ;;  %vm181_vm1 = vcmask 257024   ;;  %s392_s1 = inlined_call_operand.vmem [shape: bf16[1,32,32], index: 1, kind: input, shape index: {}]   ;;  %s393_s0 = inlined_call_operand.vmem [shape: bf16[1,128,32], index: 0, kind: input, shape index: {}]   ;;  %s394_s2 = inlined_call_operand.vmem [shape: f32[1,1,32], index: 2, kind: input, shape index: {}]   ;;  %s395_s3 = inlined_call_operand.vmem [shape: bf16[1,128,32], index: 3, kind: output, shape index: {}]  }
   0x1   :  { %v259_v0 = vld [vmem:[%s392_s1 + $0x8] sm:$0xff]  ;;  %v258_v1 = vld [vmem:[%s392_s1] sm:$0xff]  ;;  %v252_v3 = vld [vmem:[%s393_s0 + $0x10] sm:$0xff] }
   0x2   :  { %122 = vmatpush.bf16.msra.mxu0 %v259_v0  ;;  %260 = vmatpush.bf16.msra.mxu1 %v259_v0  ;;  %v250_v2 = vld [vmem:[%s393_s0] sm:$0xff]  ;;  %v256_v5 = vld [vmem:[%s393_s0 + $0x30] sm:$0xff]  ;;  %v251_v6 = vld [vmem:[%s393_s0 + $0x8] sm:$0xff] }
   0x3   :  { %261 = vmatpush.bf16.msra.mxu2 %v259_v0  ;;  %262 = vmatpush.bf16.msra.mxu3 %v259_v0  ;;  %v254_v4 = vld [vmem:[%s393_s0 + $0x20] sm:$0xff]  ;;  %v253_v7 = vld [vmem:[%s393_s0 + $0x18] sm:$0xff]  ;;  %v255_v8 = vld [vmem:[%s393_s0 + $0x28] sm:$0xff] }
   0x4   :  { %v257_v9 = vld [vmem:[%s393_s0 + $0x38] sm:$0xff]  ;;  %v266_v10 = vld [vmem:[%s394_s2] ss:$0 sm:$0xff] }
   0x6   :  { %123 = vmatpush.bf16.msra.mxu0 %v258_v1  ;;  %263 = vmatpush.bf16.msra.mxu1 %v258_v1 }
   0x7   :  { %264 = vmatpush.bf16.msra.mxu2 %v258_v1  ;;  %265 = vmatpush.bf16.msra.mxu3 %v258_v1 }
   0x9   :  { %242 = vmatmul.msk.bf16.vlgmr.msra.gmra.mxu0 %vm91_vm0, %v250_v2  ;;  %244 = vmatmul.msk.bf16.vlgmr.msra.gmra.mxu1 %vm91_vm0, %v252_v3 }
   0xa   :  { %246 = vmatmul.msk.bf16.vlgmr.msra.gmra.mxu2 %vm91_vm0, %v254_v4  ;;  %248 = vmatmul.msk.bf16.vlgmr.msra.gmra.mxu3 %vm91_vm0, %v256_v5 }
  0x19   :  { %243 = vmatmul.msk.bf16.gmra.mxu0 %vm91_vm0, %v251_v6  ;;  %245 = vmatmul.msk.bf16.gmra.mxu1 %vm91_vm0, %v253_v7 }
  0x1a   :  { %247 = vmatmul.msk.bf16.gmra.mxu2 %vm91_vm0, %v255_v8  ;;  %249 = vmatmul.msk.bf16.gmra.mxu3 %vm91_vm0, %v257_v9 }
  0x86   :  { %v125_v11 = vpop.f32.mrf.mxu0  ;;  %v135_v12 = vpop.f32.mrf.mxu1 }
  0x87   :  { %v126_v13 = vadd.f32 %v266_v10, %v125_v11  ;;  %v136_v14 = vadd.f32 %v266_v10, %v135_v12 }
  0x89   :  { %v165_v15 = vpack.c.bf16 %v126_v13, %v126_v13  ;;  %v169_v16 = vpack.c.bf16 %v136_v14, %v136_v14 }
  0x8b   :  { %182 = vst.msk [vmem:[%s395_s3] sm:$0xf] %vm181_vm1, %v165_v15 }
  0x8c   :  { %186 = vst.msk [vmem:[%s395_s3 + $0x10] sm:$0xf] %vm181_vm1, %v169_v16 }
  0x8d   :  { %v145_v17 = vpop.f32.mrf.mxu2  ;;  %v155_v18 = vpop.f32.mrf.mxu3 }
  0x8e   :  { %v146_v19 = vadd.f32 %v266_v10, %v145_v17  ;;  %v156_v20 = vadd.f32 %v266_v10, %v155_v18  ;;  %v127_v21 = vpop.f32.mrf.mxu0  ;;  %v137_v22 = vpop.f32.mrf.mxu1 }
  0x8f   :  { %v128_v23 = vadd.f32 %v266_v10, %v127_v21  ;;  %v138_v24 = vadd.f32 %v266_v10, %v137_v22 }
  0x90   :  { %v173_v25 = vpack.c.bf16 %v146_v19, %v146_v19  ;;  %v177_v26 = vpack.c.bf16 %v156_v20, %v156_v20 }
  0x91   :  { %v166_v27 = vpack.c.bf16 %v128_v23, %v128_v23  ;;  %v170_v28 = vpack.c.bf16 %v138_v24, %v138_v24 }
  0x92   :  { %190 = vst.msk [vmem:[%s395_s3 + $0x20] sm:$0xf] %vm181_vm1, %v173_v25 }
  0x93   :  { %194 = vst.msk [vmem:[%s395_s3 + $0x30] sm:$0xf] %vm181_vm1, %v177_v26 }
  0x94   :  { %183 = vst.msk [vmem:[%s395_s3 + $0x4] sm:$0xf] %vm181_vm1, %v166_v27 }
  0x95   :  { %187 = vst.msk [vmem:[%s395_s3 + $0x14] sm:$0xf] %vm181_vm1, %v170_v28  ;;  %v147_v29 = vpop.f32.mrf.mxu2  ;;  %v157_v30 = vpop.f32.mrf.mxu3 }
  0x96   :  { %v148_v31 = vadd.f32 %v266_v10, %v147_v29  ;;  %v158_v32 = vadd.f32 %v266_v10, %v157_v30  ;;  %v130_v33 = vpop.f32.mrf.mxu0  ;;  %v140_v34 = vpop.f32.mrf.mxu1 }
  0x97   :  { %v131_v35 = vadd.f32 %v266_v10, %v130_v33  ;;  %v141_v36 = vadd.f32 %v266_v10, %v140_v34 }
  0x98   :  { %v174_v37 = vpack.c.bf16 %v148_v31, %v148_v31  ;;  %v178_v38 = vpack.c.bf16 %v158_v32, %v158_v32 }
  0x99   :  { %v167_v39 = vpack.c.bf16 %v131_v35, %v131_v35  ;;  %v171_v40 = vpack.c.bf16 %v141_v36, %v141_v36 }
  0x9a   :  { %191 = vst.msk [vmem:[%s395_s3 + $0x24] sm:$0xf] %vm181_vm1, %v174_v37 }
  0x9b   :  { %195 = vst.msk [vmem:[%s395_s3 + $0x34] sm:$0xf] %vm181_vm1, %v178_v38 }
  0x9c   :  { %184 = vst.msk [vmem:[%s395_s3 + $0x8] sm:$0xf] %vm181_vm1, %v167_v39 }
  0x9d   :  { %188 = vst.msk [vmem:[%s395_s3 + $0x18] sm:$0xf] %vm181_vm1, %v171_v40  ;;  %v150_v41 = vpop.f32.mrf.mxu2  ;;  %v160_v42 = vpop.f32.mrf.mxu3 }
  0x9e   :  { %v151_v43 = vadd.f32 %v266_v10, %v150_v41  ;;  %v161_v44 = vadd.f32 %v266_v10, %v160_v42  ;;  %v132_v45 = vpop.f32.mrf.mxu0  ;;  %v142_v46 = vpop.f32.mrf.mxu1 }
  0x9f   :  { %v133_v47 = vadd.f32 %v266_v10, %v132_v45  ;;  %v143_v48 = vadd.f32 %v266_v10, %v142_v46 }
  0xa0   :  { %v175_v49 = vpack.c.bf16 %v151_v43, %v151_v43  ;;  %v179_v50 = vpack.c.bf16 %v161_v44, %v161_v44 }
  0xa1   :  { %v168_v51 = vpack.c.bf16 %v133_v47, %v133_v47  ;;  %v172_v52 = vpack.c.bf16 %v143_v48, %v143_v48 }
  0xa2   :  { %192 = vst.msk [vmem:[%s395_s3 + $0x28] sm:$0xf] %vm181_vm1, %v175_v49 }
  0xa3   :  { %196 = vst.msk [vmem:[%s395_s3 + $0x38] sm:$0xf] %vm181_vm1, %v179_v50 }
  0xa4   :  { %185 = vst.msk [vmem:[%s395_s3 + $0xc] sm:$0xf] %vm181_vm1, %v168_v51 }
  0xa5   :  { %189 = vst.msk [vmem:[%s395_s3 + $0x1c] sm:$0xf] %vm181_vm1, %v172_v52  ;;  %v152_v53 = vpop.f32.mrf.mxu2  ;;  %v162_v54 = vpop.f32.mrf.mxu3 }
  0xa6   :  { %v153_v55 = vadd.f32 %v266_v10, %v152_v53  ;;  %v163_v56 = vadd.f32 %v266_v10, %v162_v54 }
  0xa8   :  { %v176_v57 = vpack.c.bf16 %v153_v55, %v153_v55  ;;  %v180_v58 = vpack.c.bf16 %v163_v56, %v163_v56 }
  0xaa   :  { %193 = vst.msk [vmem:[%s395_s3 + $0x2c] sm:$0xf] %vm181_vm1, %v176_v57 }
  0xab   :  { %197 = vst.msk [vmem:[%s395_s3 + $0x3c] sm:$0xf] %vm181_vm1, %v180_v58 }

// kernel: decoder_recovery_forward.14
= control target key start
LH: loop header
LB: loop body
LE: loop exit
PB: predicated region body
PF: predicated region fallthrough
CT: control target
= control target key end

     0   :  { %vm205_vm0 = vcmask 1043456   ;;  %vm201_vm1 = vcmask 982016   ;;  %vm277_vm2 = vcmask 1041408   ;;  %vm279_vm3 = vcmask 1045508   ;;  %s643_s1 = inlined_call_operand.vmem [shape: bf16[120,512], index: 1, kind: input, shape index: {}]   ;;  %s644_s2 = inlined_call_operand.vmem [shape: f32[2,1], index: 2, kind: input, shape index: {}]   ;;  %s645_s0 = inlined_call_operand.vmem [shape: bf16[2,120], index: 0, kind: input, shape index: {}]   ;;  %s646_s3 = inlined_call_operand.vmem [shape: f32[2,512], index: 3, kind: output, shape index: {}]  }
   0x1   :  { %v43_v0 = vld [vmem:[%s643_s1 + $0xe0] sm:$0xff]  ;;  %v44_v1 = vld [vmem:[%s643_s1 + $0xe8] sm:$0xff]  ;;  %v430_v7 = vld [vmem:[%s643_s1 + $0xcc] sm:$0xf0] }
   0x2   :  { %v137_v2 = vunpack.c.l.b16 %v43_v0  ;;  %v138_v3 = vunpack.c.h.b16 %v43_v0  ;;  %v139_v4 = vunpack.c.l.b16 %v44_v1  ;;  %v140_v5 = vunpack.c.h.b16 %v44_v1  ;;  %v386_v6 = vld [vmem:[%s643_s1 + $0xc0] sm:$0xf]  ;;  %v428_v12 = vld [vmem:[%s643_s1 + $0xc4] sm:$0xf]  ;;  %v388_v13 = vld [vmem:[%s643_s1 + $0xd0] sm:$0xf0] }
   0x3   :  { %v394_v14 = vld [vmem:[%s643_s1 + $0xc8] sm:$0xf]  ;;  %v431_v15 = vld [vmem:[%s643_s1 + $0xd4] sm:$0xf0]  ;;  %v429_v16 = vld [vmem:[%s643_s1 + $0xcc] sm:$0xf]  ;;  %v387_v22 = vor.u32 %v430_v7, %v386_v6  ;;  %v391_v23 = vor.u32 %v428_v12, %v388_v13 }
   0x4   :  { %v169_v8 = vpack.c.b16 %v137_v2, %v137_v2  ;;  %v170_v9 = vpack.c.b16 %v138_v3, %v138_v3  ;;  %v171_v10 = vpack.c.b16 %v139_v4, %v139_v4  ;;  %v172_v11 = vpack.c.b16 %v140_v5, %v140_v5  ;;  %v396_v17 = vld [vmem:[%s643_s1 + $0xd8] sm:$0xf0]  ;;  %v370_v24 = vld [vmem:[%s643_s1 + $0xa0] sm:$0xf]  ;;  %v426_v25 = vld [vmem:[%s643_s1 + $0xac] sm:$0xf0] }
   0x5   :  { %v395_v26 = vor.u32 %v431_v15, %v394_v14  ;;  %v399_v27 = vor.u32 %v429_v16, %v396_v17  ;;  %v424_v28 = vld [vmem:[%s643_s1 + $0xa4] sm:$0xf]  ;;  %v372_v29 = vld [vmem:[%s643_s1 + $0xb0] sm:$0xf0]  ;;  %v378_v30 = vld [vmem:[%s643_s1 + $0xa8] sm:$0xf]  ;;  %v371_v34 = vor.u32 %v426_v25, %v370_v24 }
   0x6   :  { %v207_v18 = vsel %vm205_vm0, %v169_v8, 0  ;;  %v210_v19 = vsel %vm205_vm0, %v170_v9, 0  ;;  %v213_v20 = vsel %vm205_vm0, %v171_v10, 0  ;;  %v216_v21 = vsel %vm205_vm0, %v172_v11, 0  ;;  %v427_v31 = vld [vmem:[%s643_s1 + $0xb4] sm:$0xf0] }
   0x7   :  { %218 = vmatpush.bf16.msra.mxu0 %v207_v18  ;;  %231 = vmatpush.bf16.msra.mxu1 %v210_v19  ;;  %v425_v32 = vld [vmem:[%s643_s1 + $0xac] sm:$0xf]  ;;  %v380_v33 = vld [vmem:[%s643_s1 + $0xb8] sm:$0xf0]  ;;  %v375_v35 = vor.u32 %v424_v28, %v372_v29  ;;  %v354_v36 = vld [vmem:[%s643_s1 + $0x80] sm:$0xf]  ;;  %v379_v38 = vor.u32 %v427_v31, %v378_v30 }
   0x8   :  { %244 = vmatpush.bf16.msra.mxu2 %v213_v20  ;;  %257 = vmatpush.bf16.msra.mxu3 %v216_v21  ;;  %v422_v37 = vld [vmem:[%s643_s1 + $0x8c] sm:$0xf0]  ;;  %v383_v39 = vor.u32 %v425_v32, %v380_v33  ;;  %v420_v40 = vld [vmem:[%s643_s1 + $0x84] sm:$0xf]  ;;  %v356_v41 = vld [vmem:[%s643_s1 + $0x90] sm:$0xf0] }
   0x9   :  { %v362_v42 = vld [vmem:[%s643_s1 + $0x88] sm:$0xf]  ;;  %v423_v43 = vld [vmem:[%s643_s1 + $0x94] sm:$0xf0]  ;;  %v421_v44 = vld [vmem:[%s643_s1 + $0x8c] sm:$0xf]  ;;  %v355_v46 = vor.u32 %v422_v37, %v354_v36  ;;  %v359_v47 = vor.u32 %v420_v40, %v356_v41 }
   0xa   :  { %v364_v45 = vld [vmem:[%s643_s1 + $0x98] sm:$0xf0]  ;;  %v338_v48 = vld [vmem:[%s643_s1 + $0x60] sm:$0xf]  ;;  %v418_v49 = vld [vmem:[%s643_s1 + $0x6c] sm:$0xf0]  ;;  %v363_v50 = vor.u32 %v423_v43, %v362_v42 }
   0xb   :  { %219 = vmatpush.bf16.msra.mxu0 %v387_v22  ;;  %232 = vmatpush.bf16.msra.mxu1 %v391_v23  ;;  %v367_v51 = vor.u32 %v421_v44, %v364_v45  ;;  %v416_v52 = vld [vmem:[%s643_s1 + $0x64] sm:$0xf]  ;;  %v340_v53 = vld [vmem:[%s643_s1 + $0x70] sm:$0xf0]  ;;  %v346_v54 = vld [vmem:[%s643_s1 + $0x68] sm:$0xf]  ;;  %v339_v58 = vor.u32 %v418_v49, %v338_v48 }
   0xc   :  { %245 = vmatpush.bf16.msra.mxu2 %v395_v26  ;;  %258 = vmatpush.bf16.msra.mxu3 %v399_v27  ;;  %v419_v55 = vld [vmem:[%s643_s1 + $0x74] sm:$0xf0]  ;;  %v417_v56 = vld [vmem:[%s643_s1 + $0x6c] sm:$0xf]  ;;  %v348_v57 = vld [vmem:[%s643_s1 + $0x78] sm:$0xf0]  ;;  %v343_v59 = vor.u32 %v416_v52, %v340_v53 }
   0xd   :  { %v322_v60 = vld [vmem:[%s643_s1 + $0x40] sm:$0xf]  ;;  %v414_v61 = vld [vmem:[%s643_s1 + $0x4c] sm:$0xf0]  ;;  %v412_v62 = vld [vmem:[%s643_s1 + $0x44] sm:$0xf]  ;;  %v347_v63 = vor.u32 %v419_v55, %v346_v54  ;;  %v351_v0 = vor.u32 %v417_v56, %v348_v57 }
   0xe   :  { %v324_v1 = vld [vmem:[%s643_s1 + $0x50] sm:$0xf0]  ;;  %v330_v2 = vld [vmem:[%s643_s1 + $0x48] sm:$0xf]  ;;  %v415_v3 = vld [vmem:[%s643_s1 + $0x54] sm:$0xf0]  ;;  %v323_v8 = vor.u32 %v414_v61, %v322_v60 }
   0xf   :  { %220 = vmatpush.bf16.msra.mxu0 %v371_v34  ;;  %233 = vmatpush.bf16.msra.mxu1 %v375_v35  ;;  %v413_v4 = vld [vmem:[%s643_s1 + $0x4c] sm:$0xf]  ;;  %v332_v5 = vld [vmem:[%s643_s1 + $0x58] sm:$0xf0]  ;;  %v434_v6 = vmov 0   ;;  %v327_v9 = vor.u32 %v412_v62, %v324_v1  ;;  %v331_v12 = vor.u32 %v415_v3, %v330_v2 }
  0x10   :  { %246 = vmatpush.bf16.msra.mxu2 %v379_v38  ;;  %259 = vmatpush.bf16.msra.mxu3 %v383_v39  ;;  %v45_v7 = vld [vmem:[%s644_s2] sm:$0x3]  ;;  %v410_v11 = vld [vmem:[%s643_s1 + $0x2c] sm:$0xf0]  ;;  %v335_v13 = vor.u32 %v413_v4, %v332_v5  ;;  %v408_v14 = vld [vmem:[%s643_s1 + $0x24] sm:$0xf] }
  0x11   :  { %433 = vset.pattern.permute.xlu0 %v434_v6  ;;  %v306_v10 = vld [vmem:[%s643_s1 + $0x20] sm:$0xf]  ;;  %v308_v15 = vld [vmem:[%s643_s1 + $0x30] sm:$0xf0]  ;;  %v314_v16 = vld [vmem:[%s643_s1 + $0x28] sm:$0xf] }
  0x12   :  { %v411_v17 = vld [vmem:[%s643_s1 + $0x34] sm:$0xf0]  ;;  %v409_v18 = vld [vmem:[%s643_s1 + $0x2c] sm:$0xf]  ;;  %v316_v19 = vld [vmem:[%s643_s1 + $0x38] sm:$0xf0]  ;;  %48 = vperm.xlu0 %433, %v45_v7   ;;  %v307_v20 = vor.u32 %v410_v11, %v306_v10  ;;  %v311_v21 = vor.u32 %v408_v14, %v308_v15 }
  0x13   :  { %221 = vmatpush.bf16.msra.mxu0 %v355_v46  ;;  %234 = vmatpush.bf16.msra.mxu1 %v359_v47  ;;  %v290_v22 = vld [vmem:[%s643_s1] sm:$0xf]  ;;  %v406_v23 = vld [vmem:[%s643_s1 + $0xc] sm:$0xf0]  ;;  %v315_v24 = vor.u32 %v411_v17, %v314_v16  ;;  %v319_v25 = vor.u32 %v409_v18, %v316_v19  ;;  %v404_v26 = vld [vmem:[%s643_s1 + $0x4] sm:$0xf] }
  0x14   :  { %247 = vmatpush.bf16.msra.mxu2 %v363_v50  ;;  %260 = vmatpush.bf16.msra.mxu3 %v367_v51  ;;  %v292_v27 = vld [vmem:[%s643_s1 + $0x10] sm:$0xf0]  ;;  %v298_v28 = vld [vmem:[%s643_s1 + $0x8] sm:$0xf]  ;;  %v407_v29 = vld [vmem:[%s643_s1 + $0x14] sm:$0xf0]  ;;  %v291_v32 = vor.u32 %v406_v23, %v290_v22 }
  0x15   :  { %v405_v30 = vld [vmem:[%s643_s1 + $0xc] sm:$0xf]  ;;  %v300_v31 = vld [vmem:[%s643_s1 + $0x18] sm:$0xf0]  ;;  %v295_v33 = vor.u32 %v404_v26, %v292_v27  ;;  %v299_v34 = vor.u32 %v407_v29, %v298_v28  ;;  %v14_v36 = vld [vmem:[%s645_s0] sm:$0x1] }
  0x16   :  { %v303_v35 = vor.u32 %v405_v30, %v300_v31 }
  0x17   :  { %222 = vmatpush.bf16.msra.mxu0 %v339_v58  ;;  %235 = vmatpush.bf16.msra.mxu1 %v343_v59 }
  0x18   :  { %248 = vmatpush.bf16.msra.mxu2 %v347_v63  ;;  %261 = vmatpush.bf16.msra.mxu3 %v351_v0 }
  0x1b   :  { %223 = vmatpush.bf16.msra.mxu0 %v323_v8  ;;  %236 = vmatpush.bf16.msra.mxu1 %v327_v9 }
  0x1c   :  { %249 = vmatpush.bf16.msra.mxu2 %v331_v12  ;;  %262 = vmatpush.bf16.msra.mxu3 %v335_v13 }
  0x1f   :  { %224 = vmatpush.bf16.msra.mxu0 %v307_v20  ;;  %237 = vmatpush.bf16.msra.mxu1 %v311_v21 }
  0x20   :  { %250 = vmatpush.bf16.msra.mxu2 %v315_v24  ;;  %263 = vmatpush.bf16.msra.mxu3 %v319_v25 }
  0x23   :  { %225 = vmatpush.bf16.msra.mxu0 %v291_v32  ;;  %238 = vmatpush.bf16.msra.mxu1 %v295_v33 }
  0x24   :  { %251 = vmatpush.bf16.msra.mxu2 %v299_v34  ;;  %264 = vmatpush.bf16.msra.mxu3 %v303_v35 }
  0x26   :  { %400 = vmatmul.msk.bf16.vlgmr.msra.gmra.mxu0 %vm201_vm1, %v14_v36  ;;  %401 = vmatmul.msk.bf16.vlgmr.msra.gmra.mxu1 %vm201_vm1, %v14_v36 }
  0x27   :  { %402 = vmatmul.msk.bf16.vlgmr.msra.gmra.mxu2 %vm201_vm1, %v14_v36  ;;  %403 = vmatmul.msk.bf16.vlgmr.msra.gmra.mxu3 %vm201_vm1, %v14_v36 }
  0x84   :  { %v49_v39 = vpop.permute.xlu0 %48 }
  0xa3   :  { %v227_v37 = vpop.f32.mrf.mxu0  ;;  %v240_v38 = vpop.f32.mrf.mxu1 }
  0xa4   :  { %v241_v40 = vadd.f32 %v240_v38, %v49_v39  ;;  %v228_v43 = vadd.f32 %v227_v37, %v49_v39 }
  0xa6   :  { %v274_v44 = vrot.slane %v241_v40, 6 }
  0xa8   :  { %v278_v51 = vsel %vm277_vm2, %v228_v43, %v274_v44 }
  0xaa   :  { %v253_v41 = vpop.f32.mrf.mxu2  ;;  %v266_v42 = vpop.f32.mrf.mxu3 }
  0xab   :  { %v254_v45 = vadd.f32 %v253_v41, %v49_v39  ;;  %v267_v46 = vadd.f32 %v266_v42, %v49_v39  ;;  %v229_v47 = vpop.f32.mrf.mxu0  ;;  %v242_v48 = vpop.f32.mrf.mxu1 }
  0xad   :  { %v275_v49 = vrot.slane %v254_v45, 4  ;;  %v276_v50 = vrot.slane %v267_v46, 2 }
  0xaf   :  { %v280_v52 = vsel %vm279_vm3, %v275_v49, %v276_v50 }
  0xb0   :  { %v281_v53 = vsel %vm205_vm0, %v278_v51, %v280_v52 }
  0xb1   :  { %283 = vst [vmem:[%s646_s3] sm:$0xff] %v281_v53 }
  0xb2   :  { %v255_v54 = vpop.f32.mrf.mxu2  ;;  %v268_v55 = vpop.f32.mrf.mxu3 }

// kernel: decoder_recovery_forward.15
= control target key start
LH: loop header
LB: loop body
LE: loop exit
PB: predicated region body
PF: predicated region fallthrough
CT: control target
= control target key end

     0   :  { %vm18_vm0 = vcmask 154624   ;;  %s283_s0 = inlined_call_operand.vmem [shape: f32[80,19], index: 0, kind: input, shape index: {}]   ;;  %s284_s1 = inlined_call_operand.vmem [shape: f32[80,19], index: 1, kind: output, shape index: {}]  }
   0x1   :  { %v12_v0 = vld [vmem:[%s283_s0 + $0x20] sm:$0xff]  ;;  %v10_v1 = vld [vmem:[%s283_s0 + $0x10] sm:$0xff]  ;;  %v13_v6 = vld [vmem:[%s283_s0 + $0x28] sm:$0xff] }
   0x2   :  { %v8_v2 = vld [vmem:[%s283_s0] sm:$0xff]  ;;  %v31_v3 = vsel %vm18_vm0, %v12_v0, -inf  ;;  %v25_v4 = vsel %vm18_vm0, %v10_v1, -inf  ;;  %v11_v7 = vld [vmem:[%s283_s0 + $0x18] sm:$0xff]  ;;  %v9_v8 = vld [vmem:[%s283_s0 + $0x8] sm:$0xff]  ;;  %v34_v9 = vsel %vm18_vm0, %v13_v6, -inf }
   0x3   :  { %v19_v5 = vsel %vm18_vm0, %v8_v2, -inf  ;;  %32 = vmax.xlane.f32.xlu2 %v31_v3  ;;  %26 = vmax.xlane.f32.xlu1 %v25_v4  ;;  %v28_v10 = vsel %vm18_vm0, %v11_v7, -inf  ;;  %v22_v11 = vsel %vm18_vm0, %v9_v8, -inf  ;;  %v16_v12 = vld [vmem:[%s283_s0 + $0x40] sm:$0xff]  ;;  %v15_v13 = vld [vmem:[%s283_s0 + $0x38] sm:$0xff]  ;;  %v14_v14 = vld [vmem:[%s283_s0 + $0x30] sm:$0xff] }
   0x4   :  { %20 = vmax.xlane.f32.xlu0 %v19_v5  ;;  %v43_v15 = vsel %vm18_vm0, %v16_v12, -inf  ;;  %v40_v16 = vsel %vm18_vm0, %v15_v13, -inf  ;;  %v37_v17 = vsel %vm18_vm0, %v14_v14, -inf  ;;  %v17_v18 = vld [vmem:[%s283_s0 + $0x48] sm:$0xff] }
   0x5   :  { %v46_v19 = vsel %vm18_vm0, %v17_v18, -inf }
   0xb   :  { %35 = vmax.xlane.f32.xlu2 %v34_v9  ;;  %29 = vmax.xlane.f32.xlu1 %v28_v10 }
   0xc   :  { %23 = vmax.xlane.f32.xlu0 %v22_v11 }
  0x13   :  { %44 = vmax.xlane.f32.xlu2 %v43_v15  ;;  %41 = vmax.xlane.f32.xlu1 %v40_v16 }
  0x14   :  { %38 = vmax.xlane.f32.xlu0 %v37_v17 }
  0x1c   :  { %47 = vmax.xlane.f32.xlu0 %v46_v19 }
  0x76   :  { %v33_v20 = vpop.xlane.xlu2 %32  ;;  %v27_v21 = vpop.xlane.xlu1 %26 }
  0x77   :  { %v51_v22 = vsub.f32 %v10_v1, %v27_v21  ;;  %v21_v23 = vpop.xlane.xlu0 %20  ;;  %v53_v36 = vsub.f32 %v12_v0, %v33_v20 }
  0x78   :  { %v49_v24 = vsub.f32 %v8_v2, %v21_v23 }
  0x79   :  { %v63_v25 = vmul.f32 1.442695, %v51_v22  ;;  %v67_v41 = vmul.f32 1.442695, %v53_v36 }
  0x7a   :  { %v59_v26 = vmul.f32 1.442695, %v49_v24 }
  0x7b   :  { %143 = vpow2.f32 %v63_v25 }
  0x7c   :  { %145 = vpow2.f32 %v59_v26 }
  0x7e   :  { %v36_v27 = vpop.xlane.xlu2 %35  ;;  %v30_v28 = vpop.xlane.xlu1 %29 }
  0x7f   :  { %v54_v29 = vsub.f32 %v13_v6, %v36_v27  ;;  %v52_v30 = vsub.f32 %v11_v7, %v30_v28  ;;  %v24_v31 = vpop.xlane.xlu0 %23 }
  0x80   :  { %v50_v32 = vsub.f32 %v9_v8, %v24_v31 }
  0x81   :  { %v69_v33 = vmul.f32 1.442695, %v54_v29  ;;  %v65_v34 = vmul.f32 1.442695, %v52_v30  ;;  %v144_v35 = vpop.eup %143 }
  0x82   :  { %v61_v37 = vmul.f32 1.442695, %v50_v32  ;;  %v146_v38 = vpop.eup %145  ;;  %v85_v39 = vsel %vm18_vm0, %v144_v35, 0.0 }
  0x83   :  { %147 = vpow2.f32 %v69_v33  ;;  %86 = vadd.xlane.f32.xlu0 %v85_v39  ;;  %v79_v40 = vsel %vm18_vm0, %v146_v38, 0.0 }
  0x84   :  { %149 = vpow2.f32 %v65_v34  ;;  %80 = vadd.xlane.f32.xlu1 %v79_v40 }
  0x85   :  { %151 = vpow2.f32 %v61_v37 }
  0x86   :  { %v45_v42 = vpop.xlane.xlu2 %44  ;;  %v42_v43 = vpop.xlane.xlu1 %41  ;;  %153 = vpow2.f32 %v67_v41 }
  0x87   :  { %v57_v44 = vsub.f32 %v16_v12, %v45_v42  ;;  %v39_v45 = vpop.xlane.xlu0 %38  ;;  %v56_v49 = vsub.f32 %v15_v13, %v42_v43 }
  0x88   :  { %v55_v46 = vsub.f32 %v14_v14, %v39_v45 }
  0x89   :  { %v148_v47 = vpop.eup %147  ;;  %v75_v48 = vmul.f32 1.442695, %v57_v44  ;;  %v73_v56 = vmul.f32 1.442695, %v56_v49 }
  0x8a   :  { %v150_v50 = vpop.eup %149  ;;  %v71_v51 = vmul.f32 1.442695, %v55_v46  ;;  %v94_v52 = vsel %vm18_vm0, %v148_v47, 0.0 }
  0x8b   :  { %v152_v53 = vpop.eup %151  ;;  %155 = vpow2.f32 %v75_v48  ;;  %v88_v54 = vsel %vm18_vm0, %v150_v50, 0.0  ;;  %95 = vadd.xlane.f32.xlu0 %v94_v52 }
  0x8c   :  { %157 = vpow2.f32 %v71_v51  ;;  %v82_v55 = vsel %vm18_vm0, %v152_v53, 0.0  ;;  %89 = vadd.xlane.f32.xlu1 %v88_v54  ;;  %v154_v58 = vpop.eup %153 }
  0x8d   :  { %83 = vadd.xlane.f32.xlu2 %v82_v55  ;;  %159 = vpow2.f32 %v73_v56  ;;  %v91_v1 = vsel %vm18_vm0, %v154_v58, 0.0 }
  0x8f   :  { %v48_v57 = vpop.xlane.xlu0 %47 }
  0x90   :  { %v58_v59 = vsub.f32 %v17_v18, %v48_v57 }
  0x91   :  { %v156_v60 = vpop.eup %155 }
  0x92   :  { %v158_v61 = vpop.eup %157  ;;  %v77_v62 = vmul.f32 1.442695, %v58_v59  ;;  %v103_v63 = vsel %vm18_vm0, %v156_v60, 0.0 }
  0x93   :  { %v97_v0 = vsel %vm18_vm0, %v158_v61, 0.0  ;;  %104 = vadd.xlane.f32.xlu0 %v103_v63  ;;  %v160_v2 = vpop.eup %159 }
  0x94   :  { %161 = vpow2.f32 %v77_v62  ;;  %98 = vadd.xlane.f32.xlu1 %v97_v0  ;;  %v100_v4 = vsel %vm18_vm0, %v160_v2, 0.0 }
  0x95   :  { %92 = vadd.xlane.f32.xlu2 %v91_v1 }
  0x9a   :  { %v162_v3 = vpop.eup %161 }
  0x9b   :  { %v106_v5 = vsel %vm18_vm0, %v162_v3, 0.0 }
  0x9c   :  { %107 = vadd.xlane.f32.xlu1 %v106_v5 }
  0x9d   :  { %101 = vadd.xlane.f32.xlu2 %v100_v4 }
  0xf6   :  { %v87_v6 = vpop.xlane.xlu0 %86 }
  0xf7   :  { %v81_v7 = vpop.xlane.xlu1 %80  ;;  %163 = vrcp.f32 %v87_v6 }
  0xf8   :  { %165 = vrcp.f32 %v81_v7 }
  0xfd   :  { %v164_v8 = vpop.eup %163 }
  0xfe   :  { %v166_v9 = vpop.eup %165  ;;  %v121_v10 = vmul.f32 %v164_v8, %v144_v35  ;;  %v96_v11 = vpop.xlane.xlu0 %95 }
  0xff   :  { %v119_v12 = vmul.f32 %v166_v9, %v146_v38  ;;  %v90_v13 = vpop.xlane.xlu1 %89  ;;  %167 = vrcp.f32 %v96_v11 }
 0x100   :  { %v84_v14 = vpop.xlane.xlu2 %83  ;;  %131 = vst.msk [vmem:[%s284_s1 + $0x10] sm:$0xff] %vm18_vm0, %v121_v10  ;;  %169 = vrcp.f32 %v90_v13 }
 0x101   :  { %129 = vst.msk [vmem:[%s284_s1] sm:$0xff] %vm18_vm0, %v119_v12  ;;  %171 = vrcp.f32 %v84_v14 }
 0x105   :  { %v168_v15 = vpop.eup %167 }
 0x106   :  { %v170_v16 = vpop.eup %169  ;;  %v124_v17 = vmul.f32 %v168_v15, %v148_v47  ;;  %v105_v18 = vpop.xlane.xlu0 %104 }
 0x107   :  { %v172_v19 = vpop.eup %171  ;;  %v122_v20 = vmul.f32 %v170_v16, %v150_v50  ;;  %v99_v22 = vpop.xlane.xlu1 %98  ;;  %173 = vrcp.f32 %v105_v18 }
 0x108   :  { %v93_v21 = vpop.xlane.xlu2 %92  ;;  %v120_v23 = vmul.f32 %v172_v19, %v152_v53  ;;  %134 = vst.msk [vmem:[%s284_s1 + $0x28] sm:$0xff] %vm18_vm0, %v124_v17 }
 0x109   :  { %175 = vrcp.f32 %v93_v21  ;;  %132 = vst.msk [vmem:[%s284_s1 + $0x18] sm:$0xff] %vm18_vm0, %v122_v20 }
 0x10a   :  { %177 = vrcp.f32 %v99_v22  ;;  %130 = vst.msk [vmem:[%s284_s1 + $0x8] sm:$0xff] %vm18_vm0, %v120_v23 }
 0x10d   :  { %v174_v24 = vpop.eup %173 }
 0x10e   :  { %v127_v26 = vmul.f32 %v174_v24, %v156_v60 }
 0x10f   :  { %v176_v25 = vpop.eup %175  ;;  %v108_v30 = vpop.xlane.xlu1 %107 }
 0x110   :  { %v178_v27 = vpop.eup %177  ;;  %v123_v28 = vmul.f32 %v176_v25, %v154_v58  ;;  %v102_v29 = vpop.xlane.xlu2 %101  ;;  %137 = vst.msk [vmem:[%s284_s1 + $0x40] sm:$0xff] %vm18_vm0, %v127_v26 }
 0x111   :  { %v125_v31 = vmul.f32 %v178_v27, %v158_v61  ;;  %179 = vrcp.f32 %v102_v29 }
 0x112   :  { %133 = vst.msk [vmem:[%s284_s1 + $0x20] sm:$0xff] %vm18_vm0, %v123_v28  ;;  %181 = vrcp.f32 %v108_v30 }
 0x113   :  { %135 = vst.msk [vmem:[%s284_s1 + $0x30] sm:$0xff] %vm18_vm0, %v125_v31 }
 0x117   :  { %v180_v32 = vpop.eup %179 }
 0x118   :  { %v182_v33 = vpop.eup %181  ;;  %v126_v34 = vmul.f32 %v180_v32, %v160_v2 }
 0x119   :  { %v128_v35 = vmul.f32 %v182_v33, %v162_v3 }
 0x11a   :  { %136 = vst.msk [vmem:[%s284_s1 + $0x38] sm:$0xff] %vm18_vm0, %v126_v34 }
 0x11b   :  { %138 = vst.msk [vmem:[%s284_s1 + $0x48] sm:$0xff] %vm18_vm0, %v128_v35 }

</bundles_post_ra>
